<compile_context>
chip_gen: v7x
topology: tpu7x:2x2x1
jax: 0.10.0
libtpu: 0.0.40
codegen_flags: <defaults>
</compile_context>

<pallas_src>
import jax
import jax.numpy as jnp
from jax.experimental import pallas as pl
from jax.experimental.pallas import tpu as pltpu

NUM_LAYERS = 1  # Config.num_layers

LANE = 128
SUBLANE = 8
MAX_TIME_CHUNK = 16      # recurrence steps precomputed / unrolled per grid step
MAX_VOCAB_TILE_LANES = 4  # vocab tile = up to 4*128 = 512 lanes


def _round_up(x, m):
    return ((x + m - 1) // m) * m


def _largest_divisor_leq(n, cap):
    for d in range(min(cap, n), 0, -1):
        if n % d == 0:
            return d
    return 1


def _pad2(x, r, c):
    """Zero-pad a 2D array to (r, c)."""
    return jnp.zeros((r, c), x.dtype).at[: x.shape[0], : x.shape[1]].set(x)


def _pad_gate_cols(w, h, hp):
    """(K, 4*h) with PyTorch gate blocks [i, f, g, o] -> (K, 4*hp),
    each gate block zero-padded from width h to hp (keeps gate order)."""
    k = w.shape[0]
    w4 = w.reshape(k, 4, h)
    return jnp.zeros((k, 4, hp), w.dtype).at[:, :, :h].set(w4).reshape(k, 4 * hp)


def _vmem_limit_bytes(Tc, Bp, E, Hp, Tv):
    f32, bf16 = 4, 2
    scratch = (2 * Bp * Hp * f32            # h, c carry
               + Tc * Bp * 4 * Hp * f32     # gx chunk
               + Tc * Bp * Hp * bf16)       # hseq chunk (bf16)
    blocks = (Tc * Bp * E * bf16            # embeds block
              + E * 4 * Hp * bf16           # W_ih
              + Hp * 4 * Hp * bf16          # W_hh
              + 4 * Hp * f32                # bias
              + Hp * Tv * bf16 + Tv * f32   # W_out tile + b_out tile
              + 2 * Bp * Hp * f32           # h0, c0
              + Tc * Bp * Tv * f32          # logits block
              + 2 * Bp * Hp * f32)          # hN, cN
    total = scratch + 2 * blocks            # double-buffered pipeline blocks
    total = int(total * 1.25) + (1 << 20)   # ~20-25% headroom + slack
    return max(min(total, 64 << 20), 2 << 20)


# ---------------------------------------------------------------------------
# Fused kernel, grid = (time_chunks, vocab_tiles):
#   at vocab tile 0: per-chunk input-projection GEMM (bf16 MXU) + serial LSTM
#   recurrence (f32 state, bf16 h @ W_hh) writing a bf16 hidden scratch;
#   every vocab tile: bf16 output GEMM of that scratch against a W_out tile.
# ---------------------------------------------------------------------------
def lstm_fused_kernel(emb_ref, h0_ref, c0_ref, wih_ref, whh_ref, b_ref,
                      wout_ref, bout_ref,
                      logits_ref, hN_ref, cN_ref,
                      h_scr, c_scr, gx_scr, hseq_scr):
    s = pl.program_id(0)
    j = pl.program_id(1)
    Tc, Bp, E = emb_ref.shape
    Hp = h0_ref.shape[-1]

    # Initialize the recurrent carry once, at the very first grid point.
    @pl.when(jnp.logical_and(s == 0, j == 0))
    def _():
        h_scr[...] = h0_ref[...]
        c_scr[...] = c0_ref[...]

    # Recurrence for this time-chunk runs once (first vocab tile only).
    @pl.when(j == 0)
    def _():
        # Phase 1: hoisted input projection for the chunk — one bf16 GEMM.
        x2d = emb_ref[...].reshape(Tc * Bp, E)                      # bf16
        gx = (jnp.dot(x2d, wih_ref[...],
                      preferred_element_type=jnp.float32)
              + b_ref[...])                                         # f32
        gx_scr[...] = gx.reshape(Tc, Bp, 4 * Hp)

        # Phase 2: serial recurrence; only h @ W_hh is on the critical path.
        # W_hh is read from VMEM inside the step (not hoisted into vregs).
        def step(t, carry):
            h, c = carry                                            # f32
            gates = (jnp.dot(h.astype(jnp.bfloat16), whh_ref[...],
                             preferred_element_type=jnp.float32)
                     + gx_scr[t])                                   # (Bp, 4*Hp) f32
            # Gate slices are 128-lane aligned (Hp is a multiple of 128).
            i_g = jax.nn.sigmoid(gates[:, 0 * Hp:1 * Hp])
            f_g = jax.nn.sigmoid(gates[:, 1 * Hp:2 * Hp])
            g_g = jnp.tanh(gates[:, 2 * Hp:3 * Hp])
            o_g = jax.nn.sigmoid(gates[:, 3 * Hp:4 * Hp])
            c_new = f_g * c + i_g * g_g
            h_new = o_g * jnp.tanh(c_new)
            hseq_scr[t] = h_new.astype(jnp.bfloat16)                # bf16 store
            return h_new, c_new

        # Unroll is bounded by the chunk length (<= MAX_TIME_CHUNK).
        h_fin, c_fin = jax.lax.fori_loop(
            0, Tc, step, (h_scr[...], c_scr[...]), unroll=True)
        h_scr[...] = h_fin
        c_scr[...] = c_fin

    # Phase 3: output projection for this (chunk, vocab tile); bf16 MXU,
    # lane-dense f32 store.
    hs = hseq_scr[...].reshape(Tc * Bp, Hp)                         # bf16
    logits_ref[...] = (jnp.dot(hs, wout_ref[...],
                               preferred_element_type=jnp.float32)
                       + bout_ref[...])

    # Final hidden/cell state: block index never changes, so this is a cheap
    # VMEM-resident write; the HBM writeback happens once at the end.
    hN_ref[...] = h_scr[...]
    cN_ref[...] = c_scr[...]


def run_comment_model(embeds_p, h0_p, c0_p, wih_p, whh_p, b_p, wout_p, bout_p,
                      Tc, Tv):
    S, Bp, E = embeds_p.shape
    Hp = h0_p.shape[-1]
    Vp = wout_p.shape[-1]
    n_s = S // Tc
    n_v = Vp // Tv

    # TODO(synk): on v7x, add a leading "parallel" grid axis over batch halves
    # (the recurrence is independent per batch row) to use both TensorCores;
    # at Bp=8 it is not worthwhile.
    return pl.pallas_call(
        lstm_fused_kernel,
        out_shape=(jax.ShapeDtypeStruct((S * Bp, Vp), jnp.float32),
                   jax.ShapeDtypeStruct((Bp, Hp), jnp.float32),
                   jax.ShapeDtypeStruct((Bp, Hp), jnp.float32)),
        grid_spec=pltpu.PrefetchScalarGridSpec(
            num_scalar_prefetch=0,
            grid=(n_s, n_v),
            in_specs=[
                pl.BlockSpec((Tc, Bp, E), lambda s, j: (s, 0, 0)),   # embeds chunk
                pl.BlockSpec((Bp, Hp), lambda s, j: (0, 0)),         # h0
                pl.BlockSpec((Bp, Hp), lambda s, j: (0, 0)),         # c0
                pl.BlockSpec((E, 4 * Hp), lambda s, j: (0, 0)),      # W_ih (bf16)
                pl.BlockSpec((Hp, 4 * Hp), lambda s, j: (0, 0)),     # W_hh (bf16)
                pl.BlockSpec((1, 4 * Hp), lambda s, j: (0, 0)),      # bias (f32)
                pl.BlockSpec((Hp, Tv), lambda s, j: (0, j)),         # W_out tile
                pl.BlockSpec((1, Tv), lambda s, j: (0, j)),          # b_out tile
            ],
            out_specs=[
                pl.BlockSpec((Tc * Bp, Tv), lambda s, j: (s, j)),    # logits tile
                pl.BlockSpec((Bp, Hp), lambda s, j: (0, 0)),         # h_n
                pl.BlockSpec((Bp, Hp), lambda s, j: (0, 0)),         # c_n
            ],
            scratch_shapes=[
                pltpu.VMEM((Bp, Hp), jnp.float32),          # h carry (f32)
                pltpu.VMEM((Bp, Hp), jnp.float32),          # c carry (f32)
                pltpu.VMEM((Tc, Bp, 4 * Hp), jnp.float32),  # gx for one chunk
                pltpu.VMEM((Tc, Bp, Hp), jnp.bfloat16),     # hseq for one chunk
            ]),
        compiler_params=pltpu.CompilerParams(
            # Both axes carry state through VMEM scratch -> sequential.
            dimension_semantics=("arbitrary", "arbitrary"),
            vmem_limit_bytes=_vmem_limit_bytes(Tc, Bp, E, Hp, Tv)),
    )(embeds_p, h0_p, c0_p, wih_p, whh_p, b_p, wout_p, bout_p)


# ---------------------------------------------------------------------------
# CommentModel forward
# ---------------------------------------------------------------------------
def comment_model_forward(params, tokens, hidden=None):
    S, B = tokens.shape
    E = params["embedding"].shape[1]
    H = params["w_hh"].shape[0]
    V = params["w_out"].shape[1]

    Bp = _round_up(max(B, 1), SUBLANE)
    Hp = _round_up(H, LANE)
    Vp = _round_up(V, LANE)
    # Time chunk: largest divisor of S not exceeding MAX_TIME_CHUNK (keeps the
    # recurrence exact without masking padded timesteps).
    Tc = _largest_divisor_leq(S, MAX_TIME_CHUNK)
    # Vocab tile: multiple of 128 that divides Vp, at most 512 lanes.
    Tv = _largest_divisor_leq(Vp // LANE, MAX_VOCAB_TILE_LANES) * LANE

    if hidden is None:
        h_0 = jnp.zeros((NUM_LAYERS, B, H), jnp.float32)
        c_0 = jnp.zeros((NUM_LAYERS, B, H), jnp.float32)
    else:
        h_0, c_0 = hidden

    # Parameter padding to lane/sublane-aligned layout (glue; cacheable).
    # Weights are cast to bf16 (MXU operands); biases and hidden stay f32.
    wih_p = _pad_gate_cols(params["w_ih"], H, Hp).astype(jnp.bfloat16)   # (E, 4Hp)
    whh_p = _pad2(_pad_gate_cols(params["w_hh"], H, Hp),
                  Hp, 4 * Hp).astype(jnp.bfloat16)                       # (Hp, 4Hp)
    b_p = _pad_gate_cols(params["b"], H, Hp)                             # (1, 4Hp) f32
    wout_p = _pad2(params["w_out"], Hp, Vp).astype(jnp.bfloat16)         # (Hp, Vp)
    bout_p = _pad2(params["b_out"], 1, Vp)                               # (1, Vp) f32

    # Embedding lookup stays in JAX (glue); cast to bf16 for the MXU + DMA.
    # TODO(synk): fuse the gather (scalar-prefetched tokens + in-kernel gather)
    # once Mosaic gather constraints allow; at these sizes it is negligible.
    # TODO(synk): pad E to a multiple of 128 once embedding_dim grows beyond
    # toy size (lane-sparse K dim is fine at E=16 only).
    embeds = jnp.take(params["embedding"], tokens, axis=0)               # (S, B, E)
    embeds_p = (jnp.zeros((S, Bp, E), jnp.float32)
                .at[:, :B, :].set(embeds)).astype(jnp.bfloat16)

    h0_p = _pad2(h_0[0], Bp, Hp)
    c0_p = _pad2(c_0[0], Bp, Hp)

    logits_p, hN_p, cN_p = run_comment_model(
        embeds_p, h0_p, c0_p, wih_p, whh_p, b_p, wout_p, bout_p, Tc, Tv)

    logits = logits_p.reshape(S, Bp, Vp)[:, :B, :V].reshape(S * B, V)
    h_n = hN_p[:B, :H][None]
    c_n = cN_p[:B, :H][None]
    return logits, (h_n, c_n)


# Pure-JAX f32 reference for validation.
def reference_forward(params, tokens, hidden=None):
    S, B = tokens.shape
    Hd = params["w_hh"].shape[0]
    if hidden is None:
        h = jnp.zeros((B, Hd), jnp.float32)
        c = jnp.zeros((B, Hd), jnp.float32)
    else:
        h, c = hidden[0][0], hidden[1][0]
    embeds = jnp.take(params["embedding"], tokens, axis=0)

    def step(carry, x):
        h, c = carry
        gates = x @ params["w_ih"] + h @ params["w_hh"] + params["b"][0]
        i_g = jax.nn.sigmoid(gates[:, 0 * Hd:1 * Hd])
        f_g = jax.nn.sigmoid(gates[:, 1 * Hd:2 * Hd])
        g_g = jnp.tanh(gates[:, 2 * Hd:3 * Hd])
        o_g = jax.nn.sigmoid(gates[:, 3 * Hd:4 * Hd])
        c = f_g * c + i_g * g_g
        h = o_g * jnp.tanh(c)
        return (h, c), h

    (_, _), hseq = jax.lax.scan(step, (h, c), embeds)
    return hseq.reshape(S * B, Hd) @ params["w_out"] + params["b_out"][0]


if __name__ == "__main__":
    # Small, deterministic setup.
    vocab_size, embedding_dim, hidden_dim = 32, 16, 32
    seq_len, batch = 8, 2

    key = jax.random.PRNGKey(0)
    ks = jax.random.split(key, 8)
    scale = 0.1
    params = {
        "embedding": scale * jax.random.normal(ks[0], (vocab_size, embedding_dim), jnp.float32),
        # PyTorch stores W_ih as (4H, E); we keep the transposed (E, 4H) layout.
        "w_ih": scale * jax.random.normal(ks[1], (embedding_dim, 4 * hidden_dim), jnp.float32),
        "w_hh": scale * jax.random.normal(ks[2], (hidden_dim, 4 * hidden_dim), jnp.float32),
        # combined bias b_ih + b_hh, kept 2D for TPU layout
        "b": scale * jax.random.normal(ks[3], (1, 4 * hidden_dim), jnp.float32),
        "w_out": scale * jax.random.normal(ks[4], (hidden_dim, vocab_size), jnp.float32),
        "b_out": scale * jax.random.normal(ks[5], (1, vocab_size), jnp.float32),
    }

    tokens = jax.random.randint(ks[6], (seq_len, batch), 0, vocab_size, jnp.int32)

    logits, (h_n, c_n) = comment_model_forward(params, tokens, hidden=None)
    logits = jax.block_until_ready(logits)
    jax.block_until_ready(h_n)
    jax.block_until_ready(c_n)

    assert logits.shape == (seq_len * batch, vocab_size)
    assert h_n.shape == (NUM_LAYERS, batch, hidden_dim)
    assert c_n.shape == (NUM_LAYERS, batch, hidden_dim)

    # Tolerance is loosened vs the f32 reference because all matmul operands
    # are bf16 on the MXU (accumulation and recurrent state stay f32).
    ref = reference_forward(params, tokens, hidden=None)
    assert jnp.allclose(logits, ref, rtol=2e-2, atol=2e-2), "mismatch vs JAX reference"

    print("KERNEL_OK")
</pallas_src>

<mosaic_0001>
module attributes {stable_mosaic.version = 11 : i64} {
  func.func @lstm_fused_kernel(%arg0: i32, %arg1: i32, %arg2: memref<8x8x16xbf16, #tpu.memory_space<vmem>>, %arg3: memref<8x128xf32, #tpu.memory_space<vmem>>, %arg4: memref<8x128xf32, #tpu.memory_space<vmem>>, %arg5: memref<16x512xbf16, #tpu.memory_space<vmem>>, %arg6: memref<128x512xbf16, #tpu.memory_space<vmem>>, %arg7: memref<1x512xf32, #tpu.memory_space<vmem>>, %arg8: memref<128x128xbf16, #tpu.memory_space<vmem>>, %arg9: memref<1x128xf32, #tpu.memory_space<vmem>>, %arg10: memref<64x128xf32, #tpu.memory_space<vmem>>, %arg11: memref<8x128xf32, #tpu.memory_space<vmem>>, %arg12: memref<8x128xf32, #tpu.memory_space<vmem>>, %arg13: memref<8x128xf32, #tpu.memory_space<vmem>>, %arg14: memref<8x128xf32, #tpu.memory_space<vmem>>, %arg15: memref<8x8x512xf32, #tpu.memory_space<vmem>>, %arg16: memref<8x8x128xbf16, #tpu.memory_space<vmem>>) attributes {dimension_semantics = [#tpu.dimension_semantics<arbitrary>, #tpu.dimension_semantics<arbitrary>], iteration_bounds = array<i64: 1, 1>, scalar_prefetch = 0 : i64, scratch_operands = 4 : i64, tpu.core_type = #tpu.core_type<tc>, window_params = [{transform_indices = @transform_0, window_bounds = array<i64: 8, 8, 16>}, {pipeline_mode = #tpu.pipeline_mode<synchronous>, transform_indices = @transform_1, window_bounds = array<i64: 8, 128>}, {pipeline_mode = #tpu.pipeline_mode<synchronous>, transform_indices = @transform_2, window_bounds = array<i64: 8, 128>}, {pipeline_mode = #tpu.pipeline_mode<synchronous>, transform_indices = @transform_3, window_bounds = array<i64: 16, 512>}, {pipeline_mode = #tpu.pipeline_mode<synchronous>, transform_indices = @transform_4, window_bounds = array<i64: 128, 512>}, {pipeline_mode = #tpu.pipeline_mode<synchronous>, transform_indices = @transform_5, window_bounds = array<i64: 1, 512>}, {transform_indices = @transform_6, window_bounds = array<i64: 128, 128>}, {transform_indices = @transform_7, window_bounds = array<i64: 1, 128>}, {transform_indices = @transform_8, window_bounds = array<i64: 64, 128>}, {pipeline_mode = #tpu.pipeline_mode<synchronous>, transform_indices = @transform_9, window_bounds = array<i64: 8, 128>}, {pipeline_mode = #tpu.pipeline_mode<synchronous>, transform_indices = @transform_10, window_bounds = array<i64: 8, 128>}]} {
    %c0_i32 = arith.constant 0 : i32
    %0 = arith.cmpi eq, %arg0, %c0_i32 : i32
    %c0_i32_0 = arith.constant 0 : i32
    %1 = arith.cmpi eq, %arg1, %c0_i32_0 : i32
    %2 = arith.andi %0, %1 : i1
    %3 = arith.extui %2 : i1 to i32
    %c0_i32_1 = arith.constant 0 : i32
    %4 = arith.cmpi ne, %3, %c0_i32_1 : i32
    scf.if %4 {
      %c0_20 = arith.constant 0 : index
      %c0_21 = arith.constant 0 : index
      %20 = vector.load %arg3[%c0_20, %c0_21] : memref<8x128xf32, #tpu.memory_space<vmem>>, vector<8x128xf32>
      %c0_22 = arith.constant 0 : index
      %c0_23 = arith.constant 0 : index
      %21 = vector.load %arg13[%c0_22, %c0_23] : memref<8x128xf32, #tpu.memory_space<vmem>>, vector<8x128xf32>
      tpu.vector_store %arg13[%c0_22, %c0_23], %20 {strides = array<i32>} : memref<8x128xf32, #tpu.memory_space<vmem>>, vector<8x128xf32>,
      %c0_24 = arith.constant 0 : index
      %c0_25 = arith.constant 0 : index
      %22 = vector.load %arg4[%c0_24, %c0_25] : memref<8x128xf32, #tpu.memory_space<vmem>>, vector<8x128xf32>
      %c0_26 = arith.constant 0 : index
      %c0_27 = arith.constant 0 : index
      %23 = vector.load %arg14[%c0_26, %c0_27] : memref<8x128xf32, #tpu.memory_space<vmem>>, vector<8x128xf32>
      tpu.vector_store %arg14[%c0_26, %c0_27], %22 {strides = array<i32>} : memref<8x128xf32, #tpu.memory_space<vmem>>, vector<8x128xf32>,
    } else {
    }
    %c0_i32_2 = arith.constant 0 : i32
    %5 = arith.cmpi eq, %arg1, %c0_i32_2 : i32
    %6 = arith.extui %5 : i1 to i32
    %c0_i32_3 = arith.constant 0 : i32
    %7 = arith.cmpi ne, %6, %c0_i32_3 : i32
    scf.if %7 {
      %c0_20 = arith.constant 0 : index
      %c0_21 = arith.constant 0 : index
      %c0_22 = arith.constant 0 : index
      %20 = vector.load %arg2[%c0_20, %c0_21, %c0_22] : memref<8x8x16xbf16, #tpu.memory_space<vmem>>, vector<8x8x16xbf16>
      %21 = vector.shape_cast %20 : vector<8x8x16xbf16> to vector<64x16xbf16>
      %c0_23 = arith.constant 0 : index
      %c0_24 = arith.constant 0 : index
      %22 = vector.load %arg5[%c0_23, %c0_24] : memref<16x512xbf16, #tpu.memory_space<vmem>>, vector<16x512xbf16>
      %cst_25 = arith.constant dense<0.000000e+00> : vector<64x512xf32>
      %23 = tpu.matmul %21, %22, %cst_25 {dimension_numbers = #tpu.dot_dimension_numbers<[1], [0], [0], [1], [0, 0, 1, 1], [], []>} : vector<64x16xbf16>, vector<16x512xbf16>, vector<64x512xf32> -> vector<64x512xf32>
      %c0_26 = arith.constant 0 : index
      %c0_27 = arith.constant 0 : index
      %24 = vector.load %arg7[%c0_26, %c0_27] : memref<1x512xf32, #tpu.memory_space<vmem>>, vector<1x512xf32>
      %25 = vector.broadcast %24 : vector<1x512xf32> to vector<64x512xf32>
      %26 = arith.addf %23, %25 : vector<64x512xf32>
      %27 = vector.shape_cast %26 : vector<64x512xf32> to vector<8x8x512xf32>
      %c0_28 = arith.constant 0 : index
      %c0_29 = arith.constant 0 : index
      %c0_30 = arith.constant 0 : index
      %28 = vector.load %arg15[%c0_28, %c0_29, %c0_30] : memref<8x8x512xf32, #tpu.memory_space<vmem>>, vector<8x8x512xf32>
      tpu.vector_store %arg15[%c0_28, %c0_29, %c0_30], %27 {strides = array<i32>} : memref<8x8x512xf32, #tpu.memory_space<vmem>>, vector<8x8x512xf32>,
      %c0_31 = arith.constant 0 : index
      %c0_32 = arith.constant 0 : index
      %29 = vector.load %arg13[%c0_31, %c0_32] : memref<8x128xf32, #tpu.memory_space<vmem>>, vector<8x128xf32>
      %c0_33 = arith.constant 0 : index
      %c0_34 = arith.constant 0 : index
      %30 = vector.load %arg14[%c0_33, %c0_34] : memref<8x128xf32, #tpu.memory_space<vmem>>, vector<8x128xf32>
      %c0_i32_35 = arith.constant 0 : i32
      %31 = arith.truncf %29 : vector<8x128xf32> to vector<8x128xbf16>
      %c0_36 = arith.constant 0 : index
      %c0_37 = arith.constant 0 : index
      %32 = vector.load %arg6[%c0_36, %c0_37] : memref<128x512xbf16, #tpu.memory_space<vmem>>, vector<128x512xbf16>
      %cst_38 = arith.constant dense<0.000000e+00> : vector<8x512xf32>
      %33 = tpu.matmul %31, %32, %cst_38 {dimension_numbers = #tpu.dot_dimension_numbers<[1], [0], [0], [1], [0, 0, 1, 1], [], []>} : vector<8x128xbf16>, vector<128x512xbf16>, vector<8x512xf32> -> vector<8x512xf32>
      %34 = arith.index_cast %c0_i32_35 : i32 to index
      %c0_39 = arith.constant 0 : index
      %c0_40 = arith.constant 0 : index
      %35 = vector.load %arg15[%34, %c0_39, %c0_40] : memref<8x8x512xf32, #tpu.memory_space<vmem>>, vector<1x8x512xf32>
      %36 = vector.shape_cast %35 : vector<1x8x512xf32> to vector<8x512xf32>
      %37 = arith.addf %33, %36 : vector<8x512xf32>
      %38 = vector.extract_strided_slice %37 {offsets = [0, 0], sizes = [8, 128], strides = [1, 1]} : vector<8x512xf32> to vector<8x128xf32>
      %39 = arith.negf %38 : vector<8x128xf32>
      %40 = math.exp %39 : vector<8x128xf32>
      %cst_41 = arith.constant 1.000000e+00 : f32
      %41 = vector.broadcast %cst_41 : f32 to vector<8x128xf32>
      %42 = arith.addf %41, %40 : vector<8x128xf32>
      %43 = arith.divf %41, %42 : vector<8x128xf32>
      %44 = vector.extract_strided_slice %37 {offsets = [0, 128], sizes = [8, 128], strides = [1, 1]} : vector<8x512xf32> to vector<8x128xf32>
      %45 = arith.negf %44 : vector<8x128xf32>
      %46 = math.exp %45 : vector<8x128xf32>
      %cst_42 = arith.constant 1.000000e+00 : f32
      %47 = vector.broadcast %cst_42 : f32 to vector<8x128xf32>
      %48 = arith.addf %47, %46 : vector<8x128xf32>
      %49 = arith.divf %47, %48 : vector<8x128xf32>
      %50 = vector.extract_strided_slice %37 {offsets = [0, 256], sizes = [8, 128], strides = [1, 1]} : vector<8x512xf32> to vector<8x128xf32>
      %51 = math.tanh %50 : vector<8x128xf32>
      %52 = vector.extract_strided_slice %37 {offsets = [0, 384], sizes = [8, 128], strides = [1, 1]} : vector<8x512xf32> to vector<8x128xf32>
      %53 = arith.negf %52 : vector<8x128xf32>
      %54 = math.exp %53 : vector<8x128xf32>
      %cst_43 = arith.constant 1.000000e+00 : f32
      %55 = vector.broadcast %cst_43 : f32 to vector<8x128xf32>
      %56 = arith.addf %55, %54 : vector<8x128xf32>
      %57 = arith.divf %55, %56 : vector<8x128xf32>
      %58 = arith.mulf %49, %30 : vector<8x128xf32>
      %59 = arith.mulf %43, %51 : vector<8x128xf32>
      %60 = arith.addf %58, %59 : vector<8x128xf32>
      %61 = math.tanh %60 : vector<8x128xf32>
      %62 = arith.mulf %57, %61 : vector<8x128xf32>
      %63 = arith.truncf %62 : vector<8x128xf32> to vector<8x128xbf16>
      %64 = arith.index_cast %c0_i32_35 : i32 to index
      %c0_44 = arith.constant 0 : index
      %c0_45 = arith.constant 0 : index
      %65 = vector.load %arg16[%64, %c0_44, %c0_45] : memref<8x8x128xbf16, #tpu.memory_space<vmem>>, vector<1x8x128xbf16>
      %66 = vector.shape_cast %65 : vector<1x8x128xbf16> to vector<8x128xbf16>
      %67 = vector.shape_cast %63 : vector<8x128xbf16> to vector<1x8x128xbf16>
      tpu.vector_store %arg16[%64, %c0_44, %c0_45], %67 {strides = array<i32>} : memref<8x8x128xbf16, #tpu.memory_space<vmem>>, vector<1x8x128xbf16>,
      %c1_i32 = arith.constant 1 : i32
      %68 = arith.truncf %62 : vector<8x128xf32> to vector<8x128xbf16>
      %c0_46 = arith.constant 0 : index
      %c0_47 = arith.constant 0 : index
      %69 = vector.load %arg6[%c0_46, %c0_47] : memref<128x512xbf16, #tpu.memory_space<vmem>>, vector<128x512xbf16>
      %cst_48 = arith.constant dense<0.000000e+00> : vector<8x512xf32>
      %70 = tpu.matmul %68, %69, %cst_48 {dimension_numbers = #tpu.dot_dimension_numbers<[1], [0], [0], [1], [0, 0, 1, 1], [], []>} : vector<8x128xbf16>, vector<128x512xbf16>, vector<8x512xf32> -> vector<8x512xf32>
      %71 = arith.index_cast %c1_i32 : i32 to index
      %c0_49 = arith.constant 0 : index
      %c0_50 = arith.constant 0 : index
      %72 = vector.load %arg15[%71, %c0_49, %c0_50] : memref<8x8x512xf32, #tpu.memory_space<vmem>>, vector<1x8x512xf32>
      %73 = vector.shape_cast %72 : vector<1x8x512xf32> to vector<8x512xf32>
      %74 = arith.addf %70, %73 : vector<8x512xf32>
      %75 = vector.extract_strided_slice %74 {offsets = [0, 0], sizes = [8, 128], strides = [1, 1]} : vector<8x512xf32> to vector<8x128xf32>
      %76 = arith.negf %75 : vector<8x128xf32>
      %77 = math.exp %76 : vector<8x128xf32>
      %cst_51 = arith.constant 1.000000e+00 : f32
      %78 = vector.broadcast %cst_51 : f32 to vector<8x128xf32>
      %79 = arith.addf %78, %77 : vector<8x128xf32>
      %80 = arith.divf %78, %79 : vector<8x128xf32>
      %81 = vector.extract_strided_slice %74 {offsets = [0, 128], sizes = [8, 128], strides = [1, 1]} : vector<8x512xf32> to vector<8x128xf32>
      %82 = arith.negf %81 : vector<8x128xf32>
      %83 = math.exp %82 : vector<8x128xf32>
      %cst_52 = arith.constant 1.000000e+00 : f32
      %84 = vector.broadcast %cst_52 : f32 to vector<8x128xf32>
      %85 = arith.addf %84, %83 : vector<8x128xf32>
      %86 = arith.divf %84, %85 : vector<8x128xf32>
      %87 = vector.extract_strided_slice %74 {offsets = [0, 256], sizes = [8, 128], strides = [1, 1]} : vector<8x512xf32> to vector<8x128xf32>
      %88 = math.tanh %87 : vector<8x128xf32>
      %89 = vector.extract_strided_slice %74 {offsets = [0, 384], sizes = [8, 128], strides = [1, 1]} : vector<8x512xf32> to vector<8x128xf32>
      %90 = arith.negf %89 : vector<8x128xf32>
      %91 = math.exp %90 : vector<8x128xf32>
      %cst_53 = arith.constant 1.000000e+00 : f32
      %92 = vector.broadcast %cst_53 : f32 to vector<8x128xf32>
      %93 = arith.addf %92, %91 : vector<8x128xf32>
      %94 = arith.divf %92, %93 : vector<8x128xf32>
      %95 = arith.mulf %86, %60 : vector<8x128xf32>
      %96 = arith.mulf %80, %88 : vector<8x128xf32>
      %97 = arith.addf %95, %96 : vector<8x128xf32>
      %98 = math.tanh %97 : vector<8x128xf32>
      %99 = arith.mulf %94, %98 : vector<8x128xf32>
      %100 = arith.truncf %99 : vector<8x128xf32> to vector<8x128xbf16>
      %101 = arith.index_cast %c1_i32 : i32 to index
      %c0_54 = arith.constant 0 : index
      %c0_55 = arith.constant 0 : index
      %102 = vector.load %arg16[%101, %c0_54, %c0_55] : memref<8x8x128xbf16, #tpu.memory_space<vmem>>, vector<1x8x128xbf16>
      %103 = vector.shape_cast %102 : vector<1x8x128xbf16> to vector<8x128xbf16>
      %104 = vector.shape_cast %100 : vector<8x128xbf16> to vector<1x8x128xbf16>
      tpu.vector_store %arg16[%101, %c0_54, %c0_55], %104 {strides = array<i32>} : memref<8x8x128xbf16, #tpu.memory_space<vmem>>, vector<1x8x128xbf16>,
      %c2_i32 = arith.constant 2 : i32
      %105 = arith.truncf %99 : vector<8x128xf32> to vector<8x128xbf16>
      %c0_56 = arith.constant 0 : index
      %c0_57 = arith.constant 0 : index
      %106 = vector.load %arg6[%c0_56, %c0_57] : memref<128x512xbf16, #tpu.memory_space<vmem>>, vector<128x512xbf16>
      %cst_58 = arith.constant dense<0.000000e+00> : vector<8x512xf32>
      %107 = tpu.matmul %105, %106, %cst_58 {dimension_numbers = #tpu.dot_dimension_numbers<[1], [0], [0], [1], [0, 0, 1, 1], [], []>} : vector<8x128xbf16>, vector<128x512xbf16>, vector<8x512xf32> -> vector<8x512xf32>
      %108 = arith.index_cast %c2_i32 : i32 to index
      %c0_59 = arith.constant 0 : index
      %c0_60 = arith.constant 0 : index
      %109 = vector.load %arg15[%108, %c0_59, %c0_60] : memref<8x8x512xf32, #tpu.memory_space<vmem>>, vector<1x8x512xf32>
      %110 = vector.shape_cast %109 : vector<1x8x512xf32> to vector<8x512xf32>
      %111 = arith.addf %107, %110 : vector<8x512xf32>
      %112 = vector.extract_strided_slice %111 {offsets = [0, 0], sizes = [8, 128], strides = [1, 1]} : vector<8x512xf32> to vector<8x128xf32>
      %113 = arith.negf %112 : vector<8x128xf32>
      %114 = math.exp %113 : vector<8x128xf32>
      %cst_61 = arith.constant 1.000000e+00 : f32
      %115 = vector.broadcast %cst_61 : f32 to vector<8x128xf32>
      %116 = arith.addf %115, %114 : vector<8x128xf32>
      %117 = arith.divf %115, %116 : vector<8x128xf32>
      %118 = vector.extract_strided_slice %111 {offsets = [0, 128], sizes = [8, 128], strides = [1, 1]} : vector<8x512xf32> to vector<8x128xf32>
      %119 = arith.negf %118 : vector<8x128xf32>
      %120 = math.exp %119 : vector<8x128xf32>
      %cst_62 = arith.constant 1.000000e+00 : f32
      %121 = vector.broadcast %cst_62 : f32 to vector<8x128xf32>
      %122 = arith.addf %121, %120 : vector<8x128xf32>
      %123 = arith.divf %121, %122 : vector<8x128xf32>
      %124 = vector.extract_strided_slice %111 {offsets = [0, 256], sizes = [8, 128], strides = [1, 1]} : vector<8x512xf32> to vector<8x128xf32>
      %125 = math.tanh %124 : vector<8x128xf32>
      %126 = vector.extract_strided_slice %111 {offsets = [0, 384], sizes = [8, 128], strides = [1, 1]} : vector<8x512xf32> to vector<8x128xf32>
      %127 = arith.negf %126 : vector<8x128xf32>
      %128 = math.exp %127 : vector<8x128xf32>
      %cst_63 = arith.constant 1.000000e+00 : f32
      %129 = vector.broadcast %cst_63 : f32 to vector<8x128xf32>
      %130 = arith.addf %129, %128 : vector<8x128xf32>
      %131 = arith.divf %129, %130 : vector<8x128xf32>
      %132 = arith.mulf %123, %97 : vector<8x128xf32>
      %133 = arith.mulf %117, %125 : vector<8x128xf32>
      %134 = arith.addf %132, %133 : vector<8x128xf32>
      %135 = math.tanh %134 : vector<8x128xf32>
      %136 = arith.mulf %131, %135 : vector<8x128xf32>
      %137 = arith.truncf %136 : vector<8x128xf32> to vector<8x128xbf16>
      %138 = arith.index_cast %c2_i32 : i32 to index
      %c0_64 = arith.constant 0 : index
      %c0_65 = arith.constant 0 : index
      %139 = vector.load %arg16[%138, %c0_64, %c0_65] : memref<8x8x128xbf16, #tpu.memory_space<vmem>>, vector<1x8x128xbf16>
      %140 = vector.shape_cast %139 : vector<1x8x128xbf16> to vector<8x128xbf16>
      %141 = vector.shape_cast %137 : vector<8x128xbf16> to vector<1x8x128xbf16>
      tpu.vector_store %arg16[%138, %c0_64, %c0_65], %141 {strides = array<i32>} : memref<8x8x128xbf16, #tpu.memory_space<vmem>>, vector<1x8x128xbf16>,
      %c3_i32 = arith.constant 3 : i32
      %142 = arith.truncf %136 : vector<8x128xf32> to vector<8x128xbf16>
      %c0_66 = arith.constant 0 : index
      %c0_67 = arith.constant 0 : index
      %143 = vector.load %arg6[%c0_66, %c0_67] : memref<128x512xbf16, #tpu.memory_space<vmem>>, vector<128x512xbf16>
      %cst_68 = arith.constant dense<0.000000e+00> : vector<8x512xf32>
      %144 = tpu.matmul %142, %143, %cst_68 {dimension_numbers = #tpu.dot_dimension_numbers<[1], [0], [0], [1], [0, 0, 1, 1], [], []>} : vector<8x128xbf16>, vector<128x512xbf16>, vector<8x512xf32> -> vector<8x512xf32>
      %145 = arith.index_cast %c3_i32 : i32 to index
      %c0_69 = arith.constant 0 : index
      %c0_70 = arith.constant 0 : index
      %146 = vector.load %arg15[%145, %c0_69, %c0_70] : memref<8x8x512xf32, #tpu.memory_space<vmem>>, vector<1x8x512xf32>
      %147 = vector.shape_cast %146 : vector<1x8x512xf32> to vector<8x512xf32>
      %148 = arith.addf %144, %147 : vector<8x512xf32>
      %149 = vector.extract_strided_slice %148 {offsets = [0, 0], sizes = [8, 128], strides = [1, 1]} : vector<8x512xf32> to vector<8x128xf32>
      %150 = arith.negf %149 : vector<8x128xf32>
      %151 = math.exp %150 : vector<8x128xf32>
      %cst_71 = arith.constant 1.000000e+00 : f32
      %152 = vector.broadcast %cst_71 : f32 to vector<8x128xf32>
      %153 = arith.addf %152, %151 : vector<8x128xf32>
      %154 = arith.divf %152, %153 : vector<8x128xf32>
      %155 = vector.extract_strided_slice %148 {offsets = [0, 128], sizes = [8, 128], strides = [1, 1]} : vector<8x512xf32> to vector<8x128xf32>
      %156 = arith.negf %155 : vector<8x128xf32>
      %157 = math.exp %156 : vector<8x128xf32>
      %cst_72 = arith.constant 1.000000e+00 : f32
      %158 = vector.broadcast %cst_72 : f32 to vector<8x128xf32>
      %159 = arith.addf %158, %157 : vector<8x128xf32>
      %160 = arith.divf %158, %159 : vector<8x128xf32>
      %161 = vector.extract_strided_slice %148 {offsets = [0, 256], sizes = [8, 128], strides = [1, 1]} : vector<8x512xf32> to vector<8x128xf32>
      %162 = math.tanh %161 : vector<8x128xf32>
      %163 = vector.extract_strided_slice %148 {offsets = [0, 384], sizes = [8, 128], strides = [1, 1]} : vector<8x512xf32> to vector<8x128xf32>
      %164 = arith.negf %163 : vector<8x128xf32>
      %165 = math.exp %164 : vector<8x128xf32>
      %cst_73 = arith.constant 1.000000e+00 : f32
      %166 = vector.broadcast %cst_73 : f32 to vector<8x128xf32>
      %167 = arith.addf %166, %165 : vector<8x128xf32>
      %168 = arith.divf %166, %167 : vector<8x128xf32>
      %169 = arith.mulf %160, %134 : vector<8x128xf32>
      %170 = arith.mulf %154, %162 : vector<8x128xf32>
      %171 = arith.addf %169, %170 : vector<8x128xf32>
      %172 = math.tanh %171 : vector<8x128xf32>
      %173 = arith.mulf %168, %172 : vector<8x128xf32>
      %174 = arith.truncf %173 : vector<8x128xf32> to vector<8x128xbf16>
      %175 = arith.index_cast %c3_i32 : i32 to index
      %c0_74 = arith.constant 0 : index
      %c0_75 = arith.constant 0 : index
      %176 = vector.load %arg16[%175, %c0_74, %c0_75] : memref<8x8x128xbf16, #tpu.memory_space<vmem>>, vector<1x8x128xbf16>
      %177 = vector.shape_cast %176 : vector<1x8x128xbf16> to vector<8x128xbf16>
      %178 = vector.shape_cast %174 : vector<8x128xbf16> to vector<1x8x128xbf16>
      tpu.vector_store %arg16[%175, %c0_74, %c0_75], %178 {strides = array<i32>} : memref<8x8x128xbf16, #tpu.memory_space<vmem>>, vector<1x8x128xbf16>,
      %c4_i32 = arith.constant 4 : i32
      %179 = arith.truncf %173 : vector<8x128xf32> to vector<8x128xbf16>
      %c0_76 = arith.constant 0 : index
      %c0_77 = arith.constant 0 : index
      %180 = vector.load %arg6[%c0_76, %c0_77] : memref<128x512xbf16, #tpu.memory_space<vmem>>, vector<128x512xbf16>
      %cst_78 = arith.constant dense<0.000000e+00> : vector<8x512xf32>
      %181 = tpu.matmul %179, %180, %cst_78 {dimension_numbers = #tpu.dot_dimension_numbers<[1], [0], [0], [1], [0, 0, 1, 1], [], []>} : vector<8x128xbf16>, vector<128x512xbf16>, vector<8x512xf32> -> vector<8x512xf32>
      %182 = arith.index_cast %c4_i32 : i32 to index
      %c0_79 = arith.constant 0 : index
      %c0_80 = arith.constant 0 : index
      %183 = vector.load %arg15[%182, %c0_79, %c0_80] : memref<8x8x512xf32, #tpu.memory_space<vmem>>, vector<1x8x512xf32>
      %184 = vector.shape_cast %183 : vector<1x8x512xf32> to vector<8x512xf32>
      %185 = arith.addf %181, %184 : vector<8x512xf32>
      %186 = vector.extract_strided_slice %185 {offsets = [0, 0], sizes = [8, 128], strides = [1, 1]} : vector<8x512xf32> to vector<8x128xf32>
      %187 = arith.negf %186 : vector<8x128xf32>
      %188 = math.exp %187 : vector<8x128xf32>
      %cst_81 = arith.constant 1.000000e+00 : f32
      %189 = vector.broadcast %cst_81 : f32 to vector<8x128xf32>
      %190 = arith.addf %189, %188 : vector<8x128xf32>
      %191 = arith.divf %189, %190 : vector<8x128xf32>
      %192 = vector.extract_strided_slice %185 {offsets = [0, 128], sizes = [8, 128], strides = [1, 1]} : vector<8x512xf32> to vector<8x128xf32>
      %193 = arith.negf %192 : vector<8x128xf32>
      %194 = math.exp %193 : vector<8x128xf32>
      %cst_82 = arith.constant 1.000000e+00 : f32
      %195 = vector.broadcast %cst_82 : f32 to vector<8x128xf32>
      %196 = arith.addf %195, %194 : vector<8x128xf32>
      %197 = arith.divf %195, %196 : vector<8x128xf32>
      %198 = vector.extract_strided_slice %185 {offsets = [0, 256], sizes = [8, 128], strides = [1, 1]} : vector<8x512xf32> to vector<8x128xf32>
      %199 = math.tanh %198 : vector<8x128xf32>
      %200 = vector.extract_strided_slice %185 {offsets = [0, 384], sizes = [8, 128], strides = [1, 1]} : vector<8x512xf32> to vector<8x128xf32>
      %201 = arith.negf %200 : vector<8x128xf32>
      %202 = math.exp %201 : vector<8x128xf32>
      %cst_83 = arith.constant 1.000000e+00 : f32
      %203 = vector.broadcast %cst_83 : f32 to vector<8x128xf32>
      %204 = arith.addf %203, %202 : vector<8x128xf32>
      %205 = arith.divf %203, %204 : vector<8x128xf32>
      %206 = arith.mulf %197, %171 : vector<8x128xf32>
      %207 = arith.mulf %191, %199 : vector<8x128xf32>
      %208 = arith.addf %206, %207 : vector<8x128xf32>
      %209 = math.tanh %208 : vector<8x128xf32>
      %210 = arith.mulf %205, %209 : vector<8x128xf32>
      %211 = arith.truncf %210 : vector<8x128xf32> to vector<8x128xbf16>
      %212 = arith.index_cast %c4_i32 : i32 to index
      %c0_84 = arith.constant 0 : index
      %c0_85 = arith.constant 0 : index
      %213 = vector.load %arg16[%212, %c0_84, %c0_85] : memref<8x8x128xbf16, #tpu.memory_space<vmem>>, vector<1x8x128xbf16>
      %214 = vector.shape_cast %213 : vector<1x8x128xbf16> to vector<8x128xbf16>
      %215 = vector.shape_cast %211 : vector<8x128xbf16> to vector<1x8x128xbf16>
      tpu.vector_store %arg16[%212, %c0_84, %c0_85], %215 {strides = array<i32>} : memref<8x8x128xbf16, #tpu.memory_space<vmem>>, vector<1x8x128xbf16>,
      %c5_i32 = arith.constant 5 : i32
      %216 = arith.truncf %210 : vector<8x128xf32> to vector<8x128xbf16>
      %c0_86 = arith.constant 0 : index
      %c0_87 = arith.constant 0 : index
      %217 = vector.load %arg6[%c0_86, %c0_87] : memref<128x512xbf16, #tpu.memory_space<vmem>>, vector<128x512xbf16>
      %cst_88 = arith.constant dense<0.000000e+00> : vector<8x512xf32>
      %218 = tpu.matmul %216, %217, %cst_88 {dimension_numbers = #tpu.dot_dimension_numbers<[1], [0], [0], [1], [0, 0, 1, 1], [], []>} : vector<8x128xbf16>, vector<128x512xbf16>, vector<8x512xf32> -> vector<8x512xf32>
      %219 = arith.index_cast %c5_i32 : i32 to index
      %c0_89 = arith.constant 0 : index
      %c0_90 = arith.constant 0 : index
      %220 = vector.load %arg15[%219, %c0_89, %c0_90] : memref<8x8x512xf32, #tpu.memory_space<vmem>>, vector<1x8x512xf32>
      %221 = vector.shape_cast %220 : vector<1x8x512xf32> to vector<8x512xf32>
      %222 = arith.addf %218, %221 : vector<8x512xf32>
      %223 = vector.extract_strided_slice %222 {offsets = [0, 0], sizes = [8, 128], strides = [1, 1]} : vector<8x512xf32> to vector<8x128xf32>
      %224 = arith.negf %223 : vector<8x128xf32>
      %225 = math.exp %224 : vector<8x128xf32>
      %cst_91 = arith.constant 1.000000e+00 : f32
      %226 = vector.broadcast %cst_91 : f32 to vector<8x128xf32>
      %227 = arith.addf %226, %225 : vector<8x128xf32>
      %228 = arith.divf %226, %227 : vector<8x128xf32>
      %229 = vector.extract_strided_slice %222 {offsets = [0, 128], sizes = [8, 128], strides = [1, 1]} : vector<8x512xf32> to vector<8x128xf32>
      %230 = arith.negf %229 : vector<8x128xf32>
      %231 = math.exp %230 : vector<8x128xf32>
      %cst_92 = arith.constant 1.000000e+00 : f32
      %232 = vector.broadcast %cst_92 : f32 to vector<8x128xf32>
      %233 = arith.addf %232, %231 : vector<8x128xf32>
      %234 = arith.divf %232, %233 : vector<8x128xf32>
      %235 = vector.extract_strided_slice %222 {offsets = [0, 256], sizes = [8, 128], strides = [1, 1]} : vector<8x512xf32> to vector<8x128xf32>
      %236 = math.tanh %235 : vector<8x128xf32>
      %237 = vector.extract_strided_slice %222 {offsets = [0, 384], sizes = [8, 128], strides = [1, 1]} : vector<8x512xf32> to vector<8x128xf32>
      %238 = arith.negf %237 : vector<8x128xf32>
      %239 = math.exp %238 : vector<8x128xf32>
      %cst_93 = arith.constant 1.000000e+00 : f32
      %240 = vector.broadcast %cst_93 : f32 to vector<8x128xf32>
      %241 = arith.addf %240, %239 : vector<8x128xf32>
      %242 = arith.divf %240, %241 : vector<8x128xf32>
      %243 = arith.mulf %234, %208 : vector<8x128xf32>
      %244 = arith.mulf %228, %236 : vector<8x128xf32>
      %245 = arith.addf %243, %244 : vector<8x128xf32>
      %246 = math.tanh %245 : vector<8x128xf32>
      %247 = arith.mulf %242, %246 : vector<8x128xf32>
      %248 = arith.truncf %247 : vector<8x128xf32> to vector<8x128xbf16>
      %249 = arith.index_cast %c5_i32 : i32 to index
      %c0_94 = arith.constant 0 : index
      %c0_95 = arith.constant 0 : index
      %250 = vector.load %arg16[%249, %c0_94, %c0_95] : memref<8x8x128xbf16, #tpu.memory_space<vmem>>, vector<1x8x128xbf16>
      %251 = vector.shape_cast %250 : vector<1x8x128xbf16> to vector<8x128xbf16>
      %252 = vector.shape_cast %248 : vector<8x128xbf16> to vector<1x8x128xbf16>
      tpu.vector_store %arg16[%249, %c0_94, %c0_95], %252 {strides = array<i32>} : memref<8x8x128xbf16, #tpu.memory_space<vmem>>, vector<1x8x128xbf16>,
      %c6_i32 = arith.constant 6 : i32
      %253 = arith.truncf %247 : vector<8x128xf32> to vector<8x128xbf16>
      %c0_96 = arith.constant 0 : index
      %c0_97 = arith.constant 0 : index
      %254 = vector.load %arg6[%c0_96, %c0_97] : memref<128x512xbf16, #tpu.memory_space<vmem>>, vector<128x512xbf16>
      %cst_98 = arith.constant dense<0.000000e+00> : vector<8x512xf32>
      %255 = tpu.matmul %253, %254, %cst_98 {dimension_numbers = #tpu.dot_dimension_numbers<[1], [0], [0], [1], [0, 0, 1, 1], [], []>} : vector<8x128xbf16>, vector<128x512xbf16>, vector<8x512xf32> -> vector<8x512xf32>
      %256 = arith.index_cast %c6_i32 : i32 to index
      %c0_99 = arith.constant 0 : index
      %c0_100 = arith.constant 0 : index
      %257 = vector.load %arg15[%256, %c0_99, %c0_100] : memref<8x8x512xf32, #tpu.memory_space<vmem>>, vector<1x8x512xf32>
      %258 = vector.shape_cast %257 : vector<1x8x512xf32> to vector<8x512xf32>
      %259 = arith.addf %255, %258 : vector<8x512xf32>
      %260 = vector.extract_strided_slice %259 {offsets = [0, 0], sizes = [8, 128], strides = [1, 1]} : vector<8x512xf32> to vector<8x128xf32>
      %261 = arith.negf %260 : vector<8x128xf32>
      %262 = math.exp %261 : vector<8x128xf32>
      %cst_101 = arith.constant 1.000000e+00 : f32
      %263 = vector.broadcast %cst_101 : f32 to vector<8x128xf32>
      %264 = arith.addf %263, %262 : vector<8x128xf32>
      %265 = arith.divf %263, %264 : vector<8x128xf32>
      %266 = vector.extract_strided_slice %259 {offsets = [0, 128], sizes = [8, 128], strides = [1, 1]} : vector<8x512xf32> to vector<8x128xf32>
      %267 = arith.negf %266 : vector<8x128xf32>
      %268 = math.exp %267 : vector<8x128xf32>
      %cst_102 = arith.constant 1.000000e+00 : f32
      %269 = vector.broadcast %cst_102 : f32 to vector<8x128xf32>
      %270 = arith.addf %269, %268 : vector<8x128xf32>
      %271 = arith.divf %269, %270 : vector<8x128xf32>
      %272 = vector.extract_strided_slice %259 {offsets = [0, 256], sizes = [8, 128], strides = [1, 1]} : vector<8x512xf32> to vector<8x128xf32>
      %273 = math.tanh %272 : vector<8x128xf32>
      %274 = vector.extract_strided_slice %259 {offsets = [0, 384], sizes = [8, 128], strides = [1, 1]} : vector<8x512xf32> to vector<8x128xf32>
      %275 = arith.negf %274 : vector<8x128xf32>
      %276 = math.exp %275 : vector<8x128xf32>
      %cst_103 = arith.constant 1.000000e+00 : f32
      %277 = vector.broadcast %cst_103 : f32 to vector<8x128xf32>
      %278 = arith.addf %277, %276 : vector<8x128xf32>
      %279 = arith.divf %277, %278 : vector<8x128xf32>
      %280 = arith.mulf %271, %245 : vector<8x128xf32>
      %281 = arith.mulf %265, %273 : vector<8x128xf32>
      %282 = arith.addf %280, %281 : vector<8x128xf32>
      %283 = math.tanh %282 : vector<8x128xf32>
      %284 = arith.mulf %279, %283 : vector<8x128xf32>
      %285 = arith.truncf %284 : vector<8x128xf32> to vector<8x128xbf16>
      %286 = arith.index_cast %c6_i32 : i32 to index
      %c0_104 = arith.constant 0 : index
      %c0_105 = arith.constant 0 : index
      %287 = vector.load %arg16[%286, %c0_104, %c0_105] : memref<8x8x128xbf16, #tpu.memory_space<vmem>>, vector<1x8x128xbf16>
      %288 = vector.shape_cast %287 : vector<1x8x128xbf16> to vector<8x128xbf16>
      %289 = vector.shape_cast %285 : vector<8x128xbf16> to vector<1x8x128xbf16>
      tpu.vector_store %arg16[%286, %c0_104, %c0_105], %289 {strides = array<i32>} : memref<8x8x128xbf16, #tpu.memory_space<vmem>>, vector<1x8x128xbf16>,
      %c7_i32 = arith.constant 7 : i32
      %290 = arith.truncf %284 : vector<8x128xf32> to vector<8x128xbf16>
      %c0_106 = arith.constant 0 : index
      %c0_107 = arith.constant 0 : index
      %291 = vector.load %arg6[%c0_106, %c0_107] : memref<128x512xbf16, #tpu.memory_space<vmem>>, vector<128x512xbf16>
      %cst_108 = arith.constant dense<0.000000e+00> : vector<8x512xf32>
      %292 = tpu.matmul %290, %291, %cst_108 {dimension_numbers = #tpu.dot_dimension_numbers<[1], [0], [0], [1], [0, 0, 1, 1], [], []>} : vector<8x128xbf16>, vector<128x512xbf16>, vector<8x512xf32> -> vector<8x512xf32>
      %293 = arith.index_cast %c7_i32 : i32 to index
      %c0_109 = arith.constant 0 : index
      %c0_110 = arith.constant 0 : index
      %294 = vector.load %arg15[%293, %c0_109, %c0_110] : memref<8x8x512xf32, #tpu.memory_space<vmem>>, vector<1x8x512xf32>
      %295 = vector.shape_cast %294 : vector<1x8x512xf32> to vector<8x512xf32>
      %296 = arith.addf %292, %295 : vector<8x512xf32>
      %297 = vector.extract_strided_slice %296 {offsets = [0, 0], sizes = [8, 128], strides = [1, 1]} : vector<8x512xf32> to vector<8x128xf32>
      %298 = arith.negf %297 : vector<8x128xf32>
      %299 = math.exp %298 : vector<8x128xf32>
      %cst_111 = arith.constant 1.000000e+00 : f32
      %300 = vector.broadcast %cst_111 : f32 to vector<8x128xf32>
      %301 = arith.addf %300, %299 : vector<8x128xf32>
      %302 = arith.divf %300, %301 : vector<8x128xf32>
      %303 = vector.extract_strided_slice %296 {offsets = [0, 128], sizes = [8, 128], strides = [1, 1]} : vector<8x512xf32> to vector<8x128xf32>
      %304 = arith.negf %303 : vector<8x128xf32>
      %305 = math.exp %304 : vector<8x128xf32>
      %cst_112 = arith.constant 1.000000e+00 : f32
      %306 = vector.broadcast %cst_112 : f32 to vector<8x128xf32>
      %307 = arith.addf %306, %305 : vector<8x128xf32>
      %308 = arith.divf %306, %307 : vector<8x128xf32>
      %309 = vector.extract_strided_slice %296 {offsets = [0, 256], sizes = [8, 128], strides = [1, 1]} : vector<8x512xf32> to vector<8x128xf32>
      %310 = math.tanh %309 : vector<8x128xf32>
      %311 = vector.extract_strided_slice %296 {offsets = [0, 384], sizes = [8, 128], strides = [1, 1]} : vector<8x512xf32> to vector<8x128xf32>
      %312 = arith.negf %311 : vector<8x128xf32>
      %313 = math.exp %312 : vector<8x128xf32>
      %cst_113 = arith.constant 1.000000e+00 : f32
      %314 = vector.broadcast %cst_113 : f32 to vector<8x128xf32>
      %315 = arith.addf %314, %313 : vector<8x128xf32>
      %316 = arith.divf %314, %315 : vector<8x128xf32>
      %317 = arith.mulf %308, %282 : vector<8x128xf32>
      %318 = arith.mulf %302, %310 : vector<8x128xf32>
      %319 = arith.addf %317, %318 : vector<8x128xf32>
      %320 = math.tanh %319 : vector<8x128xf32>
      %321 = arith.mulf %316, %320 : vector<8x128xf32>
      %322 = arith.truncf %321 : vector<8x128xf32> to vector<8x128xbf16>
      %323 = arith.index_cast %c7_i32 : i32 to index
      %c0_114 = arith.constant 0 : index
      %c0_115 = arith.constant 0 : index
      %324 = vector.load %arg16[%323, %c0_114, %c0_115] : memref<8x8x128xbf16, #tpu.memory_space<vmem>>, vector<1x8x128xbf16>
      %325 = vector.shape_cast %324 : vector<1x8x128xbf16> to vector<8x128xbf16>
      %326 = vector.shape_cast %322 : vector<8x128xbf16> to vector<1x8x128xbf16>
      tpu.vector_store %arg16[%323, %c0_114, %c0_115], %326 {strides = array<i32>} : memref<8x8x128xbf16, #tpu.memory_space<vmem>>, vector<1x8x128xbf16>,
      %c8_i32 = arith.constant 8 : i32
      %c0_116 = arith.constant 0 : index
      %c0_117 = arith.constant 0 : index
      %327 = vector.load %arg13[%c0_116, %c0_117] : memref<8x128xf32, #tpu.memory_space<vmem>>, vector<8x128xf32>
      tpu.vector_store %arg13[%c0_116, %c0_117], %321 {strides = array<i32>} : memref<8x128xf32, #tpu.memory_space<vmem>>, vector<8x128xf32>,
      %c0_118 = arith.constant 0 : index
      %c0_119 = arith.constant 0 : index
      %328 = vector.load %arg14[%c0_118, %c0_119] : memref<8x128xf32, #tpu.memory_space<vmem>>, vector<8x128xf32>
      tpu.vector_store %arg14[%c0_118, %c0_119], %319 {strides = array<i32>} : memref<8x128xf32, #tpu.memory_space<vmem>>, vector<8x128xf32>,
    } else {
    }
    %c0 = arith.constant 0 : index
    %c0_4 = arith.constant 0 : index
    %c0_5 = arith.constant 0 : index
    %8 = vector.load %arg16[%c0, %c0_4, %c0_5] : memref<8x8x128xbf16, #tpu.memory_space<vmem>>, vector<8x8x128xbf16>
    %9 = vector.shape_cast %8 : vector<8x8x128xbf16> to vector<64x128xbf16>
    %c0_6 = arith.constant 0 : index
    %c0_7 = arith.constant 0 : index
    %10 = vector.load %arg8[%c0_6, %c0_7] : memref<128x128xbf16, #tpu.memory_space<vmem>>, vector<128x128xbf16>
    %cst = arith.constant dense<0.000000e+00> : vector<64x128xf32>
    %11 = tpu.matmul %9, %10, %cst {dimension_numbers = #tpu.dot_dimension_numbers<[1], [0], [0], [1], [0, 0, 1, 1], [], []>} : vector<64x128xbf16>, vector<128x128xbf16>, vector<64x128xf32> -> vector<64x128xf32>
    %c0_8 = arith.constant 0 : index
    %c0_9 = arith.constant 0 : index
    %12 = vector.load %arg9[%c0_8, %c0_9] : memref<1x128xf32, #tpu.memory_space<vmem>>, vector<1x128xf32>
    %13 = vector.broadcast %12 : vector<1x128xf32> to vector<64x128xf32>
    %14 = arith.addf %11, %13 : vector<64x128xf32>
    %c0_10 = arith.constant 0 : index
    %c0_11 = arith.constant 0 : index
    %15 = vector.load %arg10[%c0_10, %c0_11] : memref<64x128xf32, #tpu.memory_space<vmem>>, vector<64x128xf32>
    tpu.vector_store %arg10[%c0_10, %c0_11], %14 {strides = array<i32>} : memref<64x128xf32, #tpu.memory_space<vmem>>, vector<64x128xf32>,
    %c0_12 = arith.constant 0 : index
    %c0_13 = arith.constant 0 : index
    %16 = vector.load %arg13[%c0_12, %c0_13] : memref<8x128xf32, #tpu.memory_space<vmem>>, vector<8x128xf32>
    %c0_14 = arith.constant 0 : index
    %c0_15 = arith.constant 0 : index
    %17 = vector.load %arg11[%c0_14, %c0_15] : memref<8x128xf32, #tpu.memory_space<vmem>>, vector<8x128xf32>
    tpu.vector_store %arg11[%c0_14, %c0_15], %16 {strides = array<i32>} : memref<8x128xf32, #tpu.memory_space<vmem>>, vector<8x128xf32>,
    %c0_16 = arith.constant 0 : index
    %c0_17 = arith.constant 0 : index
    %18 = vector.load %arg14[%c0_16, %c0_17] : memref<8x128xf32, #tpu.memory_space<vmem>>, vector<8x128xf32>
    %c0_18 = arith.constant 0 : index
    %c0_19 = arith.constant 0 : index
    %19 = vector.load %arg12[%c0_18, %c0_19] : memref<8x128xf32, #tpu.memory_space<vmem>>, vector<8x128xf32>
    tpu.vector_store %arg12[%c0_18, %c0_19], %18 {strides = array<i32>} : memref<8x128xf32, #tpu.memory_space<vmem>>, vector<8x128xf32>,
    return
  }
  func.func @transform_0(%arg0: i32, %arg1: i32) -> (i32, i32, i32) {
    %c0_i32 = arith.constant 0 : i32
    %c0_i32_0 = arith.constant 0 : i32
    %c0_i32_1 = arith.constant 0 : i32
    return %arg0, %c0_i32, %c0_i32_0 : i32, i32, i32
  }
  func.func @transform_1(%arg0: i32, %arg1: i32) -> (i32, i32) {
    %c0_i32 = arith.constant 0 : i32
    %c0_i32_0 = arith.constant 0 : i32
    %c0_i32_1 = arith.constant 0 : i32
    return %c0_i32, %c0_i32_0 : i32, i32
  }
  func.func @transform_2(%arg0: i32, %arg1: i32) -> (i32, i32) {
    %c0_i32 = arith.constant 0 : i32
    %c0_i32_0 = arith.constant 0 : i32
    %c0_i32_1 = arith.constant 0 : i32
    return %c0_i32, %c0_i32_0 : i32, i32
  }
  func.func @transform_3(%arg0: i32, %arg1: i32) -> (i32, i32) {
    %c0_i32 = arith.constant 0 : i32
    %c0_i32_0 = arith.constant 0 : i32
    %c0_i32_1 = arith.constant 0 : i32
    return %c0_i32, %c0_i32_0 : i32, i32
  }
  func.func @transform_4(%arg0: i32, %arg1: i32) -> (i32, i32) {
    %c0_i32 = arith.constant 0 : i32
    %c0_i32_0 = arith.constant 0 : i32
    %c0_i32_1 = arith.constant 0 : i32
    return %c0_i32, %c0_i32_0 : i32, i32
  }
  func.func @transform_5(%arg0: i32, %arg1: i32) -> (i32, i32) {
    %c0_i32 = arith.constant 0 : i32
    %c0_i32_0 = arith.constant 0 : i32
    %c0_i32_1 = arith.constant 0 : i32
    return %c0_i32, %c0_i32_0 : i32, i32
  }
  func.func @transform_6(%arg0: i32, %arg1: i32) -> (i32, i32) {
    %c0_i32 = arith.constant 0 : i32
    %c0_i32_0 = arith.constant 0 : i32
    return %c0_i32, %arg1 : i32, i32
  }
  func.func @transform_7(%arg0: i32, %arg1: i32) -> (i32, i32) {
    %c0_i32 = arith.constant 0 : i32
    %c0_i32_0 = arith.constant 0 : i32
    return %c0_i32, %arg1 : i32, i32
  }
  func.func @transform_8(%arg0: i32, %arg1: i32) -> (i32, i32) {
    %c0_i32 = arith.constant 0 : i32
    return %arg0, %arg1 : i32, i32
  }
  func.func @transform_9(%arg0: i32, %arg1: i32) -> (i32, i32) {
    %c0_i32 = arith.constant 0 : i32
    %c0_i32_0 = arith.constant 0 : i32
    %c0_i32_1 = arith.constant 0 : i32
    return %c0_i32, %c0_i32_0 : i32, i32
  }
  func.func @transform_10(%arg0: i32, %arg1: i32) -> (i32, i32) {
    %c0_i32 = arith.constant 0 : i32
    %c0_i32_0 = arith.constant 0 : i32
    %c0_i32_1 = arith.constant 0 : i32
    return %c0_i32, %c0_i32_0 : i32, i32
  }
}

</mosaic_0001>

<bundles_post_ra>
// kernel: tpu_custom_call.1
= control target key start
LH: loop header
LB: loop body
LE: loop exit
PB: predicated region body
PF: predicated region fallthrough
CT: control target
= control target key end

     0   :  { %16 = vsyncpa [#allocation7], 0  ;;  %s4658_s0 = inlined_call_operand.hbm [shape: bf16[8,8,16], index: 0, kind: input, shape index: {}]   ;;  %s4659_s1 = inlined_call_operand.hbm [shape: f32[8,128], index: 1, kind: input, shape index: {}]   ;;  %s4660_s2 = inlined_call_operand.hbm [shape: f32[8,128], index: 2, kind: input, shape index: {}]   ;;  %s4661_s3 = inlined_call_operand.hbm [shape: bf16[16,512], index: 3, kind: input, shape index: {}]   ;;  %s4662_s4 = inlined_call_operand.hbm [shape: bf16[128,512], index: 4, kind: input, shape index: {}]   ;;  %s4663_s5 = inlined_call_operand.vmem [shape: f32[1,512], index: 5, kind: input, shape index: {}]   ;;  %s4664_s6 = inlined_call_operand.hbm [shape: bf16[128,128], index: 6, kind: input, shape index: {}]   ;;  %s4665_s7 = inlined_call_operand.vmem [shape: f32[1,128], index: 7, kind: input, shape index: {}]   ;;  %s4666_s8 = inlined_call_operand.hbm [shape: f32[64,128], index: 8, kind: output, shape index: {0}]   ;;  %s4667_s9 = inlined_call_operand.hbm [shape: f32[8,128], index: 9, kind: output, shape index: {1}]   ;;  %s4668_s10 = inlined_call_operand.hbm [shape: f32[8,128], index: 10, kind: output, shape index: {2}]  }
   0x1   :  { %17 = vsyncpa [#allocation10], 0 }
   0x2   :  { %18 = vsyncpa [#allocation13], 0 }
   0x3   :  { %19 = vsyncpa [#allocation16], 0 }
   0x4   :  { %20 = vsyncpa [#allocation8], 0 }
   0x5   :  { %21 = vsyncpa [#allocation19], 0  ;;  %s3898_s13 = smov [#allocation9]   ;;  %s3899_s15 = smov [#allocation12]  }
   0x6   :  { %s40_s14 = sshll.u32 %s3898_s13, 4  ;;  %s59_s16 = sshll.u32 %s3899_s15, 4  ;;  %s41_s14 = int_to_ptr.vmem [resolvable:$true] %s40_s14  ;;  %s3969_s16 = int_to_ptr.vmem [resolvable:$true] %s59_s16 }
   0x7   :  { %s3688_s19 = scalar_lea.hbm %s4659_s1, 128 }
   0x8   :  { %p3689_p0 = scmp.ne.s32.totalorder %s4659_s1, %s3688_s19  ;;  %p3692_p1 = scmp.lt.u32.totalorder %s3688_s19, %s4659_s1 }
   0xa   :  { %p3694_p2 = pnand %p3692_p1, %p3689_p0 }
   0xc   :  { %3697 = shalt.err (!%p3694_p2)
}
   0xd   :  { %s3698_s24 = scalar_lea.vmem %s41_s14, 128  ;;  %p3703_p4 = scmp.lt.s32.totalorder %s41_s14, %s41_s14 }
   0xe   :  { %p3699_p3 = scmp.ne.s32.totalorder %s41_s14, %s3698_s24  ;;  %p3704_p5 = scmp.lt.s32.totalorder %s3698_s24, %s3698_s24 }
  0x10   :  { %p3705_p6 = por %p3704_p5, %p3703_p4 }
  0x12   :  { %p3706_p7 = pnand %p3705_p6, %p3699_p3 }
  0x14   :  { %3709 = shalt.err (!%p3706_p7)
}
  0x15   :  { %43 = dma.hbm_to_vmem [thread:$0]  %s4659_s1, 128, %s41_s14, [#allocation10]  }
  0x16   :  { %s3710_s29 = scalar_lea.hbm %s4661_s3, 512 }
  0x17   :  { %p3711_p8 = scmp.ne.s32.totalorder %s4661_s3, %s3710_s29  ;;  %p3714_p9 = scmp.lt.u32.totalorder %s3710_s29, %s4661_s3 }
  0x19   :  { %p3716_p10 = pnand %p3714_p9, %p3711_p8 }
  0x1b   :  { %3719 = shalt.err (!%p3716_p10)
}
  0x1c   :  { %s3720_s15 = scalar_lea.vmem %s3969_s16, 512  ;;  %p3725_p12 = scmp.lt.s32.totalorder %s3969_s16, %s3969_s16 }
  0x1d   :  { %p3721_p11 = scmp.ne.s32.totalorder %s3969_s16, %s3720_s15  ;;  %p3726_p13 = scmp.lt.s32.totalorder %s3720_s15, %s3720_s15 }
  0x1f   :  { %p3727_p0 = por %p3726_p13, %p3725_p12 }
  0x21   :  { %p3728_p1 = pnand %p3727_p0, %p3721_p11 }
  0x23   :  { %3731 = shalt.err (!%p3728_p1)
}
  0x24   :  { %s3900_s1 = smov 256   ;;  %s3901_s14 = smov 16  }
  0x25   :  { %65 = dma.hbm_to_vmem [thread:$0]  %s4661_s3, 512, %s3969_s16, [#allocation13], %s3900_s1, %s3900_s1, %s3901_s14  }
  0x26   :  { %s3902_s19 = smov [#allocation6]   ;;  %s3732_s23 = scalar_lea.hbm %s4658_s0, 512 }
  0x27   :  { %s27_s20 = sshll.u32 %s3902_s19, 4  ;;  %p3733_p2 = scmp.ne.s32.totalorder %s4658_s0, %s3732_s23  ;;  %s28_s20 = int_to_ptr.vmem [resolvable:$true] %s27_s20 }
  0x28   :  { %p3736_p3 = scmp.lt.u32.totalorder %s3732_s23, %s4658_s0 }
  0x2a   :  { %p3738_p4 = pnand %p3736_p3, %p3733_p2 }
  0x2c   :  { %3741 = shalt.err (!%p3738_p4)
}
  0x2d   :  { %s3742_s28 = scalar_lea.vmem %s28_s20, 512  ;;  %p3747_p6 = scmp.lt.s32.totalorder %s28_s20, %s28_s20 }
  0x2e   :  { %p3743_p5 = scmp.ne.s32.totalorder %s28_s20, %s3742_s28  ;;  %p3748_p7 = scmp.lt.s32.totalorder %s3742_s28, %s3742_s28 }
  0x30   :  { %p3749_p8 = por %p3748_p7, %p3747_p6 }
  0x32   :  { %p3750_p9 = pnand %p3749_p8, %p3743_p5 }
  0x34   :  { %3753 = shalt.err (!%p3750_p9)
}
  0x35   :  { %s3903_s3 = smov 64   ;;  %s3904_s16 = smov 4  }
  0x36   :  { %33 = dma.hbm_to_vmem [thread:$0]  %s4658_s0, 512, %s28_s20, [#allocation7], %s3903_s3, %s3903_s3, %s3904_s16  }
  0x37   :  { %s3905_s11 = smov [#allocation11]   ;;  %s3906_s13 = smov [#allocation14]  }
  0x38   :  { %s50_s12 = sshll.u32 %s3905_s11, 4  ;;  %s71_s15 = sshll.u32 %s3906_s13, 4  ;;  %s51_s12 = int_to_ptr.vmem [resolvable:$true] %s50_s12  ;;  %s72_s15 = int_to_ptr.vmem [resolvable:$true] %s71_s15 }
  0x39   :  { %s3754_s19 = scalar_lea.hbm %s4660_s2, 128 }
  0x3a   :  { %p3755_p10 = scmp.ne.s32.totalorder %s4660_s2, %s3754_s19  ;;  %p3758_p11 = scmp.lt.u32.totalorder %s3754_s19, %s4660_s2 }
  0x3c   :  { %p3760_p12 = pnand %p3758_p11, %p3755_p10 }
  0x3e   :  { %3763 = shalt.err (!%p3760_p12)
}
  0x3f   :  { %s3764_s0 = scalar_lea.vmem %s51_s12, 128  ;;  %p3769_p0 = scmp.lt.s32.totalorder %s51_s12, %s51_s12 }
  0x40   :  { %p3765_p13 = scmp.ne.s32.totalorder %s51_s12, %s3764_s0  ;;  %p3770_p1 = scmp.lt.s32.totalorder %s3764_s0, %s3764_s0 }
  0x42   :  { %p3771_p2 = por %p3770_p1, %p3769_p0 }
  0x44   :  { %p3772_p3 = pnand %p3771_p2, %p3765_p13 }
  0x46   :  { %3775 = shalt.err (!%p3772_p3)
}
  0x47   :  { %53 = dma.hbm_to_vmem [thread:$0]  %s4660_s2, 128, %s51_s12, [#allocation10]  }
  0x48   :  { %s3776_s28 = scalar_lea.hbm %s4662_s4, 4096 }
  0x49   :  { %p3777_p4 = scmp.ne.s32.totalorder %s4662_s4, %s3776_s28  ;;  %p3780_p5 = scmp.lt.u32.totalorder %s3776_s28, %s4662_s4 }
  0x4b   :  { %p3782_p6 = pnand %p3780_p5, %p3777_p4 }
  0x4d   :  { %3785 = shalt.err (!%p3782_p6)
}
  0x4e   :  { %s3786_s17 = scalar_lea.vmem %s72_s15, 4096  ;;  %p3791_p8 = scmp.lt.s32.totalorder %s72_s15, %s72_s15 }
  0x4f   :  { %p3787_p7 = scmp.ne.s32.totalorder %s72_s15, %s3786_s17  ;;  %p3792_p9 = scmp.lt.s32.totalorder %s3786_s17, %s3786_s17 }
  0x51   :  { %p3793_p10 = por %p3792_p9, %p3791_p8 }
  0x53   :  { %p3794_p11 = pnand %p3793_p10, %p3787_p7 }
  0x55   :  { %3797 = shalt.err (!%p3794_p11)
}
  0x56   :  { %77 = dma.hbm_to_vmem [thread:$0]  %s4662_s4, 4096, %s72_s15, [#allocation13], %s3900_s1, %s3900_s1, %s3901_s14  }
  0x57   :  { %s3907_s18 = smov [#allocation15]   ;;  %s3798_s23 = scalar_lea.hbm %s4664_s6, 1024 }
  0x58   :  { %s85_s19 = sshll.u32 %s3907_s18, 4  ;;  %p3799_p12 = scmp.ne.s32.totalorder %s4664_s6, %s3798_s23  ;;  %s86_s19 = int_to_ptr.vmem [resolvable:$true] %s85_s19 }
  0x59   :  { %p3802_p13 = scmp.lt.u32.totalorder %s3798_s23, %s4664_s6 }
  0x5b   :  { %p3804_p0 = pnand %p3802_p13, %p3799_p12 }
  0x5d   :  { %3807 = shalt.err (!%p3804_p0)
}
  0x5e   :  { %s3808_s26 = scalar_lea.vmem %s86_s19, 1024  ;;  %p3813_p2 = scmp.lt.s32.totalorder %s86_s19, %s86_s19 }
  0x5f   :  { %p3809_p1 = scmp.ne.s32.totalorder %s86_s19, %s3808_s26  ;;  %p3814_p3 = scmp.lt.s32.totalorder %s3808_s26, %s3808_s26 }
  0x61   :  { %p3815_p4 = por %p3814_p3, %p3813_p2 }
  0x63   :  { %p3816_p5 = pnand %p3815_p4, %p3809_p1 }
  0x65   :  { %3819 = shalt.err (!%p3816_p5)
}
  0x66   :  { %91 = dma.hbm_to_vmem [thread:$0]  %s4664_s6, 1024, %s86_s19, [#allocation16], %s3903_s3, %s3903_s3, %s3904_s16  }
  0x67   :  { %3886 = dma.done.wait [#allocation7], 512  }
  0x68   :  { %3887 = vsyncadd [#allocation7], 4294966784 }
  0x69   :  { %3888 = dma.done.wait [#allocation10], 256  }
  0x6a   :  { %3889 = vsyncadd [#allocation10], 4294967040 }
  0x6b   :  { %3890 = dma.done.wait [#allocation13], 4608  }
  0x6c   :  { %3891 = vsyncadd [#allocation13], 4294962688 }
  0x6d   :  { %3892 = dma.done.wait [#allocation16], 1024  }
  0x6e   :  { %3893 = vsyncadd [#allocation16], 4294966272  ;;  %v4669_v0 = vmov 0   ;;  %v3430_v1 = vld [vmem:[#allocation12 + $0xc] ss:$16 sps:$4 sm:$0xff]   ;;  %v3433_v3 = vld [vmem:[#allocation6] sm:$0xff]   ;;  %v140_v43 = vlaneseq }
  0x6f   :  { %318 = vmatprep.mubr.bf16.mxu1 %v4669_v0  ;;  %245 = vmatprep.mubr.bf16.mxu0 %v4669_v0  ;;  %v3432_v2 = vld [vmem:[#allocation12 + $0x8] ss:$16 sps:$4 sm:$0xff]   ;;  %vm200_vm0 = vcmask 130048   ;;  %v4062_v4 = vld [vmem:[#allocation14] ss:$16 sps:$4 sm:$0xff]  }
  0x70   :  { %286 = vmatprep.subr.bf16.mxu1 %v3430_v1  ;;  %v4064_v5 = vld [vmem:[#allocation14 + $0x4] ss:$16 sps:$4 sm:$0xff]   ;;  %v4071_v7 = vld [vmem:[#allocation14 + $0x20] ss:$16 sps:$4 sm:$0xff]   ;;  %v3440_v9 = vld [vmem:[#allocation6 + $0x8] sm:$0xff]   ;;  %v141_v44 = vshrl.u32 %v140_v43, 7 }
  0x71   :  { %287 = vmatpush1.bf16.msra.mxu1 %v3432_v2  ;;  %v4066_v6 = vld [vmem:[#allocation14 + $0x24] ss:$16 sps:$4 sm:$0xff]   ;;  %v4078_v10 = vld [vmem:[#allocation14 + $0x40] ss:$16 sps:$4 sm:$0xff]   ;;  %v3454_v21 = vld [vmem:[#allocation6 + $0x18] sm:$0xff]  }
  0x72   :  { %590 = vmatprep.subr.bf16.mxu1 %v4064_v5  ;;  %v4075_v8 = vld [vmem:[#allocation14 + $0x44] ss:$16 sps:$4 sm:$0xff]   ;;  %v4084_v12 = vld [vmem:[#allocation14 + $0x60] ss:$16 sps:$4 sm:$0xff]   ;;  %v4122_v26 = vld [vmem:[#allocation14 + $0xc] ss:$16 sps:$4 sm:$0xff]  }
  0x73   :  { %v4081_v11 = vld [vmem:[#allocation14 + $0x64] ss:$16 sps:$4 sm:$0xff]   ;;  %v3460_v14 = vld [vmem:[#allocation12] ss:$16 sps:$4 sm:$0xff]   ;;  %v4129_v27 = vld [vmem:[#allocation14 + $0x8] ss:$16 sps:$4 sm:$0xff]  }
  0x74   :  { %3081 = vmatmul.mubr.msk.bf16.vlgmr.msra.gmra.mrb[0].mxu1 %vm200_vm0, %v3433_v3  ;;  %v3458_v13 = vld [vmem:[#allocation12 + $0x4] ss:$16 sps:$4 sm:$0xff]   ;;  %v4092_v17 = vld [vmem:[#allocation14 + $0x80] ss:$16 sps:$4 sm:$0xff]   ;;  %v4132_v29 = vld [vmem:[#allocation14 + $0x2c] ss:$16 sps:$4 sm:$0xff]  }
  0x75   :  { %591 = vmatpush1.bf16.msra.mxu1 %v4062_v4  ;;  %328 = vmatprep.mubr.bf16.mxu1 %v4669_v0  ;;  %v4089_v15 = vld [vmem:[#allocation14 + $0x84] ss:$16 sps:$4 sm:$0xff]   ;;  %v4102_v19 = vld [vmem:[#allocation14 + $0xa0] ss:$16 sps:$4 sm:$0xff]   ;;  %v4138_v30 = vld [vmem:[#allocation14 + $0x28] ss:$16 sps:$4 sm:$0xff]  }
  0x76   :  { %592 = vmatprep.subr.bf16.mxu1 %v4066_v6  ;;  %213 = vmatprep.subr.bf16.mxu0 %v3458_v13  ;;  %v3447_v16 = vld [vmem:[#allocation6 + $0x10] sm:$0xff]   ;;  %v119_v25 = vld [vmem:[#allocation9] sm:$0xff]  ;;  %v4141_v31 = vld [vmem:[#allocation14 + $0x4c] ss:$16 sps:$4 sm:$0xff]   ;;  %v150_v45 = vsub.s32 2, %v141_v44  ;;  %v154_v47 = vsub.s32 3, %v141_v44 }
  0x77   :  { %214 = vmatpush1.bf16.msra.mxu0 %v3460_v14  ;;  %v4096_v18 = vld [vmem:[#allocation14 + $0xa4] ss:$16 sps:$4 sm:$0xff]   ;;  %v4112_v22 = vld [vmem:[#allocation14 + $0xc0] ss:$16 sps:$4 sm:$0xff]   ;;  %v393_v28 = vpack.c.bf16 %v119_v25, %v119_v25  ;;  %v4148_v32 = vld [vmem:[#allocation14 + $0x48] ss:$16 sps:$4 sm:$0xff]  }
  0x78   :  { %895 = vmatprep.subr.bf16.mxu0 %v4064_v5  ;;  %v4106_v20 = vld [vmem:[#allocation14 + $0xc4] ss:$16 sps:$4 sm:$0xff]   ;;  %v4118_v24 = vld [vmem:[#allocation14 + $0xe0] ss:$16 sps:$4 sm:$0xff]   ;;  %v4151_v33 = vld [vmem:[#allocation14 + $0x6c] ss:$16 sps:$4 sm:$0xff]  }
  0x79   :  { %593 = vmatpush1.bf16.msra.mxu1 %v4071_v7  ;;  %v4116_v23 = vld [vmem:[#allocation14 + $0xe4] ss:$16 sps:$4 sm:$0xff]   ;;  %v4161_v34 = vld [vmem:[#allocation14 + $0x68] ss:$16 sps:$4 sm:$0xff]   ;;  %v4165_v35 = vld [vmem:[#allocation14 + $0x8c] ss:$16 sps:$4 sm:$0xff]  }
  0x7a   :  { %594 = vmatprep.subr.bf16.mxu1 %v4075_v8  ;;  %3077 = vmatmul.mubr.msk.bf16.vlgmr.msra.gmra.mrb[0].mxu0 %vm200_vm0, %v3433_v3  ;;  %v4169_v36 = vld [vmem:[#allocation14 + $0x88] ss:$16 sps:$4 sm:$0xff]   ;;  %v4173_v37 = vld [vmem:[#allocation14 + $0xac] ss:$16 sps:$4 sm:$0xff]   ;;  %v138_v46 = vld [vmem:[%s4663_s5] sm:$0xf] }
  0x7b   :  { %896 = vmatpush1.bf16.msra.mxu0 %v4062_v4  ;;  %255 = vmatprep.mubr.bf16.mxu0 %v4669_v0  ;;  %v4176_v38 = vld [vmem:[#allocation14 + $0xa8] ss:$16 sps:$4 sm:$0xff]   ;;  %v4179_v39 = vld [vmem:[#allocation14 + $0xcc] ss:$16 sps:$4 sm:$0xff]   ;;  %v4213_v48 = vrot.slane %v138_v46, %v150_v45  ;;  %v4219_v51 = vrot.slane %v138_v46, %v154_v47  ;;  %v142_v1 = vsub.s32 0, %v141_v44  ;;  %v146_v2 = vsub.s32 1, %v141_v44 }
  0x7c   :  { %3082 = vmatmul.mubr.msk.bf16.gmra.mrb[4].mxu1 %vm200_vm0, %v3440_v9  ;;  %897 = vmatprep.subr.bf16.mxu0 %v4066_v6  ;;  %v4182_v40 = vld [vmem:[#allocation14 + $0xc8] ss:$16 sps:$4 sm:$0xff]   ;;  %v4185_v41 = vld [vmem:[#allocation14 + $0xec] ss:$16 sps:$4 sm:$0xff]  }
  0x7d   :  { %595 = vmatpush1.bf16.msra.mxu1 %v4078_v10  ;;  %338 = vmatprep.mubr.bf16.mxu1 %v4669_v0  ;;  %v4188_v42 = vld [vmem:[#allocation14 + $0xe8] ss:$16 sps:$4 sm:$0xff]   ;;  %v143_v13 = vrot.slane %v138_v46, %v142_v1  ;;  %v147_v25 = vrot.slane %v138_v46, %v146_v2 }
  0x7e   :  { %596 = vmatprep.subr.bf16.mxu1 %v4081_v11 }
  0x7f   :  { %898 = vmatpush1.bf16.msra.mxu0 %v4071_v7 }
  0x80   :  { %899 = vmatprep.subr.bf16.mxu0 %v4075_v8 }
  0x81   :  { %597 = vmatpush1.bf16.msra.mxu1 %v4084_v12 }
  0x82   :  { %598 = vmatprep.subr.bf16.mxu1 %v4089_v15  ;;  %3078 = vmatmul.mubr.msk.bf16.gmra.mrb[4].mxu0 %vm200_vm0, %v3440_v9 }
  0x83   :  { %900 = vmatpush1.bf16.msra.mxu0 %v4078_v10  ;;  %265 = vmatprep.mubr.bf16.mxu0 %v4669_v0 }
  0x84   :  { %3083 = vmatmul.mubr.msk.bf16.gmra.mrb[8].mxu1 %vm200_vm0, %v3447_v16  ;;  %901 = vmatprep.subr.bf16.mxu0 %v4081_v11 }
  0x85   :  { %599 = vmatpush1.bf16.msra.mxu1 %v4092_v17  ;;  %348 = vmatprep.mubr.bf16.mxu1 %v4669_v0 }
  0x86   :  { %600 = vmatprep.subr.bf16.mxu1 %v4096_v18 }
  0x87   :  { %902 = vmatpush1.bf16.msra.mxu0 %v4084_v12 }
  0x88   :  { %903 = vmatprep.subr.bf16.mxu0 %v4089_v15 }
  0x89   :  { %601 = vmatpush1.bf16.msra.mxu1 %v4102_v19 }
  0x8a   :  { %602 = vmatprep.subr.bf16.mxu1 %v4106_v20  ;;  %3079 = vmatmul.mubr.msk.bf16.gmra.mrb[8].mxu0 %vm200_vm0, %v3447_v16 }
  0x8b   :  { %904 = vmatpush1.bf16.msra.mxu0 %v4092_v17  ;;  %275 = vmatprep.mubr.bf16.mxu0 %v4669_v0 }
  0x8c   :  { %3084 = vmatmul.mubr.msk.bf16.gmra.mrb[12].mxu1 %vm200_vm0, %v3454_v21  ;;  %905 = vmatprep.subr.bf16.mxu0 %v4096_v18 }
  0x8d   :  { %603 = vmatpush1.bf16.msra.mxu1 %v4112_v22  ;;  %622 = vmatprep.mubr.bf16.mxu1 %v4669_v0 }
  0x8e   :  { %604 = vmatprep.subr.bf16.mxu1 %v4116_v23 }
  0x8f   :  { %906 = vmatpush1.bf16.msra.mxu0 %v4102_v19 }
  0x90   :  { %907 = vmatprep.subr.bf16.mxu0 %v4106_v20 }
  0x91   :  { %605 = vmatpush1.bf16.msra.mxu1 %v4118_v24 }
  0x92   :  { %631 = vmatprep.subr.bf16.mxu1 %v4122_v26  ;;  %3080 = vmatmul.mubr.msk.bf16.gmra.mrb[12].mxu0 %vm200_vm0, %v3454_v21 }
  0x93   :  { %908 = vmatpush1.bf16.msra.mxu0 %v4112_v22  ;;  %927 = vmatprep.mubr.bf16.mxu0 %v4669_v0 }
  0x94   :  { %623 = vmatmul.mubr.bf16.vlgmr.msra.gmra.mrb[16].mxu1 %v393_v28  ;;  %909 = vmatprep.subr.bf16.mxu0 %v4116_v23 }
  0x95   :  { %632 = vmatpush1.bf16.msra.mxu1 %v4129_v27  ;;  %663 = vmatprep.mubr.bf16.mxu1 %v4669_v0 }
  0x96   :  { %633 = vmatprep.subr.bf16.mxu1 %v4132_v29 }
  0x97   :  { %910 = vmatpush1.bf16.msra.mxu0 %v4118_v24 }
  0x98   :  { %1201 = vmatprep.subr.bf16.mxu0 %v4064_v5 }
  0x99   :  { %634 = vmatpush1.bf16.msra.mxu1 %v4138_v30 }
  0x9a   :  { %635 = vmatprep.subr.bf16.mxu1 %v4141_v31 }
  0x9d   :  { %636 = vmatpush1.bf16.msra.mxu1 %v4148_v32 }
  0x9e   :  { %637 = vmatprep.subr.bf16.mxu1 %v4151_v33 }
  0xa1   :  { %638 = vmatpush1.bf16.msra.mxu1 %v4161_v34 }
  0xa2   :  { %639 = vmatprep.subr.bf16.mxu1 %v4165_v35 }
  0xa5   :  { %640 = vmatpush1.bf16.msra.mxu1 %v4169_v36 }
  0xa6   :  { %641 = vmatprep.subr.bf16.mxu1 %v4173_v37 }
  0xa9   :  { %642 = vmatpush1.bf16.msra.mxu1 %v4176_v38 }
  0xaa   :  { %643 = vmatprep.subr.bf16.mxu1 %v4179_v39 }
  0xad   :  { %644 = vmatpush1.bf16.msra.mxu1 %v4182_v40 }
  0xae   :  { %645 = vmatprep.subr.bf16.mxu1 %v4185_v41 }
  0xb1   :  { %646 = vmatpush1.bf16.msra.mxu1 %v4188_v42 }
  0xb2   :  { %936 = vmatprep.subr.bf16.mxu1 %v4122_v26 }
  0xb4   :  { %664 = vmatmul.mubr.bf16.vlgmr.msra.gmra.mrb[20].mxu1 %v393_v28 }
  0xb5   :  { %937 = vmatpush1.bf16.msra.mxu1 %v4129_v27  ;;  %968 = vmatprep.mubr.bf16.mxu1 %v4669_v0 }
  0xb6   :  { %938 = vmatprep.subr.bf16.mxu1 %v4132_v29 }
  0xb9   :  { %939 = vmatpush1.bf16.msra.mxu1 %v4138_v30 }
  0xba   :  { %940 = vmatprep.subr.bf16.mxu1 %v4141_v31 }
  0xbd   :  { %941 = vmatpush1.bf16.msra.mxu1 %v4148_v32 }
  0xbe   :  { %942 = vmatprep.subr.bf16.mxu1 %v4151_v33 }
  0xc1   :  { %943 = vmatpush1.bf16.msra.mxu1 %v4161_v34 }
  0xc2   :  { %944 = vmatprep.subr.bf16.mxu1 %v4165_v35 }
  0xc5   :  { %945 = vmatpush1.bf16.msra.mxu1 %v4169_v36 }
  0xc6   :  { %946 = vmatprep.subr.bf16.mxu1 %v4173_v37 }
  0xc9   :  { %947 = vmatpush1.bf16.msra.mxu1 %v4176_v38 }
  0xca   :  { %948 = vmatprep.subr.bf16.mxu1 %v4179_v39 }
  0xcd   :  { %949 = vmatpush1.bf16.msra.mxu1 %v4182_v40 }
  0xce   :  { %950 = vmatprep.subr.bf16.mxu1 %v4185_v41 }
  0xd1   :  { %951 = vmatpush1.bf16.msra.mxu1 %v4188_v42 }
  0xd2   :  { %1242 = vmatprep.subr.bf16.mxu1 %v4122_v26 }
 0x147   :  { %v4215_v49 = vpop.f32.mrb[0].mxu1 }
 0x148   :  { %v4217_v50 = vpop.f32.mrb[1].mxu1 }
 0x149   :  { %v324_v52 = vpop.f32.mrb[2].mxu1 }
 0x14a   :  { %v4222_v53 = vadd.f32 %v324_v52, %v4213_v48  ;;  %v326_v54 = vpop.f32.mrb[3].mxu1 }
 0x14b   :  { %v4225_v55 = vadd.f32 %v326_v54, %v4219_v51 }
 0x14d   :  { %v247_v3 = vpop.f32.mrb[0].mxu0 }
 0x14e   :  { %v249_v14 = vpop.f32.mrb[1].mxu0 }
 0x14f   :  { %v330_v56 = vpop.f32.mrb[4].mxu1  ;;  %v251_v28 = vpop.f32.mrb[2].mxu0 }
 0x150   :  { %v4228_v57 = vadd.f32 %v330_v56, %v4213_v48  ;;  %v332_v58 = vpop.f32.mrb[5].mxu1  ;;  %v4245_v47 = vadd.f32 %v251_v28, %v143_v13  ;;  %v253_v52 = vpop.f32.mrb[3].mxu0 }
 0x151   :  { %v4231_v59 = vadd.f32 %v332_v58, %v4219_v51  ;;  %v334_v60 = vpop.f32.mrb[6].mxu1  ;;  %v4250_v56 = vadd.f32 %v253_v52, %v147_v25 }
 0x152   :  { %v4234_v61 = vadd.f32 %v334_v60, %v4213_v48  ;;  %v336_v62 = vpop.f32.mrb[7].mxu1 }
 0x153   :  { %4671 = vst [vmem:[#allocation27_spill] sm:$0xff] %v4231_v59  ;;  %v4237_v63 = vadd.f32 %v336_v62, %v4219_v51 }
 0x154   :  { %4672 = vst [vmem:[#allocation28_spill] sm:$0xff] %v4234_v61 }
 0x155   :  { %4673 = vst [vmem:[#allocation29_spill] sm:$0xff] %v4237_v63  ;;  %v257_v60 = vpop.f32.mrb[4].mxu0 }
 0x156   :  { %v4255_v46 = vadd.f32 %v257_v60, %v143_v13  ;;  %v259_v1 = vpop.f32.mrb[5].mxu0 }
 0x157   :  { %v340_v9 = vpop.f32.mrb[8].mxu1  ;;  %v261_v28 = vpop.f32.mrb[6].mxu0 }
 0x158   :  { %v4240_v16 = vadd.f32 %v340_v9, %v4213_v48  ;;  %v342_v21 = vpop.f32.mrb[9].mxu1  ;;  %v4265_v0 = vadd.f32 %v261_v28, %v143_v13 }
 0x159   :  { %v4243_v43 = vadd.f32 %v342_v21, %v4219_v51  ;;  %v344_v45 = vpop.f32.mrb[10].mxu1  ;;  %v4260_v21 = vadd.f32 %v259_v1, %v147_v25  ;;  %v250_v1 = vadd.f32 %v249_v14, %v147_v25 }
 0x15a   :  { %4674 = vst [vmem:[#allocation30_spill] sm:$0xff] %v4240_v16  ;;  %v4248_v54 = vadd.f32 %v344_v45, %v4213_v48  ;;  %v346_v44 = vpop.f32.mrb[11].mxu1  ;;  %4680 = vst [vmem:[#allocation36_spill] sm:$0xff] %v4265_v0 }
 0x15b   :  { %4675 = vst [vmem:[#allocation31_spill] sm:$0xff] %v4243_v43  ;;  %v4253_v58 = vadd.f32 %v346_v44, %v4219_v51  ;;  %v263_v44 = vpop.f32.mrb[7].mxu0 }
 0x15c   :  { %4676 = vst [vmem:[#allocation32_spill] sm:$0xff] %v4248_v54  ;;  %v4270_v54 = vadd.f32 %v263_v44, %v147_v25 }
 0x15d   :  { %4677 = vst [vmem:[#allocation33_spill] sm:$0xff] %v4253_v58  ;;  %v267_v43 = vpop.f32.mrb[8].mxu0 }
 0x15e   :  { %4682 = vst [vmem:[#allocation38_spill] sm:$0xff] %v4270_v54  ;;  %v4275_v63 = vadd.f32 %v267_v43, %v143_v13 }
 0x15f   :  { %v350_v62 = vpop.f32.mrb[12].mxu1 }
 0x160   :  { %v4258_v2 = vadd.f32 %v350_v62, %v4213_v48  ;;  %v352_v9 = vpop.f32.mrb[13].mxu1  ;;  %4684 = vst [vmem:[#allocation40_spill] sm:$0xff] %v4275_v63 }
 0x161   :  { %v4263_v45 = vadd.f32 %v352_v9, %v4219_v51  ;;  %v354_v52 = vpop.f32.mrb[14].mxu1  ;;  %v269_v9 = vpop.f32.mrb[9].mxu0 }
 0x162   :  { %4678 = vst [vmem:[#allocation34_spill] sm:$0xff] %v4258_v2  ;;  %v4268_v58 = vadd.f32 %v354_v52, %v4213_v48  ;;  %v356_v60 = vpop.f32.mrb[15].mxu1  ;;  %v248_v2 = vadd.f32 %v247_v3, %v143_v13  ;;  %v4277_v61 = vadd.f32 %v269_v9, %v147_v25  ;;  %v271_v0 = vpop.f32.mrb[10].mxu0 }
 0x163   :  { %4679 = vst [vmem:[#allocation35_spill] sm:$0xff] %v4263_v45  ;;  %v4273_v62 = vadd.f32 %v356_v60, %v4219_v51  ;;  %v4279_v59 = vadd.f32 %v271_v0, %v143_v13  ;;  %v273_v44 = vpop.f32.mrb[11].mxu0 }
 0x164   :  { %4681 = vst [vmem:[#allocation37_spill] sm:$0xff] %v4268_v58  ;;  %v4281_v60 = vadd.f32 %v273_v44, %v147_v25 }
 0x165   :  { %4683 = vst [vmem:[#allocation39_spill] sm:$0xff] %v4273_v62  ;;  %v277_v3 = vpop.f32.mrb[12].mxu0 }
 0x166   :  { %v4283_v14 = vadd.f32 %v277_v3, %v143_v13  ;;  %v279_v62 = vpop.f32.mrb[13].mxu0  ;;  %v321_v3 = vadd.f32 %v4215_v49, %v4213_v48 }
 0x167   :  { %v624_v16 = vpop.f32.mrb[16].mxu1  ;;  %v4285_v43 = vadd.f32 %v279_v62, %v147_v25  ;;  %v281_v63 = vpop.f32.mrb[14].mxu0  ;;  %v323_v62 = vadd.f32 %v4217_v50, %v4219_v51 }
 0x168   :  { %v625_v45 = vadd.f32 %v624_v16, %v248_v2  ;;  %v626_v28 = vpop.f32.mrb[17].mxu1  ;;  %v4287_v16 = vadd.f32 %v281_v63, %v143_v13  ;;  %v283_v2 = vpop.f32.mrb[15].mxu0 }
 0x169   :  { %v627_v52 = vadd.f32 %v626_v28, %v250_v1  ;;  %v628_v58 = vpop.f32.mrb[18].mxu1  ;;  %4685 = vst [vmem:[#allocation41_spill] sm:$0xff] %v4285_v43  ;;  %v4289_v9 = vadd.f32 %v283_v2, %v147_v25 }
 0x16a   :  { %v629_v54 = vpop.f32.mrb[19].mxu1  ;;  %4686 = vst [vmem:[#allocation42_spill] sm:$0xff] %v4287_v16  ;;  %v3117_v58 = vmul.f32 -1.442695, %v625_v45 }
 0x16b   :  { %4687 = vst [vmem:[#allocation43_spill] sm:$0xff] %v4289_v9  ;;  %v3118_v1 = vmul.f32 -1.442695, %v627_v52 }
 0x16d   :  { %3560 = vpow2.f32 %v3118_v1 }
 0x16e   :  { %3562 = vpow2.f32 %v3117_v58  ;;  %v121_v58 = vld [vmem:[#allocation11] sm:$0xff] }
 0x177   :  { %v3561_v0 = vpop.eup %3560 }
 0x178   :  { %v3563_v54 = vpop.eup %3562  ;;  %v681_v28 = vadd.f32 1.0, %v3561_v0 }
 0x179   :  { %v675_v44 = vadd.f32 1.0, %v3563_v54 }
 0x17a   :  { %3564 = vrcp.f32 %v681_v28 }
 0x17b   :  { %3566 = vrcp.f32 %v675_v44 }
 0x184   :  { %v3565_v1 = vpop.eup %3564 }
 0x185   :  { %v3567_v0 = vpop.eup %3566  ;;  %v691_v9 = vmul.f32 %v3565_v1, %v121_v58 }
 0x187   :  { %v665_v43 = vpop.f32.mrb[20].mxu1 }
 0x188   :  { %v666_v63 = vadd.f32 %v665_v43, %v321_v3  ;;  %v667_v13 = vpop.f32.mrb[21].mxu1 }
 0x189   :  { %v668_v25 = vadd.f32 %v667_v13, %v323_v62  ;;  %v669_v52 = vpop.f32.mrb[22].mxu1 }
 0x18a   :  { %3568 = vtanh.f32 %v666_v63  ;;  %v670_v45 = vpop.f32.mrb[23].mxu1 }
 0x18b   :  { %v3119_v2 = vmul.f32 -1.442695, %v668_v25 }
 0x18d   :  { %3570 = vpow2.f32 %v3119_v2 }
 0x194   :  { %v3569_v54 = vpop.eup %3568 }
 0x195   :  { %v692_v48 = vmul.f32 %v3569_v54, %v3567_v0 }
 0x197   :  { %v3571_v49 = vpop.eup %3570  ;;  %v4295_v16 = vadd.f32 %v692_v48, %v691_v9  ;;  %v4688_v9 = vmov 0  }
 0x198   :  { %v688_v50 = vadd.f32 1.0, %v3571_v49 }
 0x199   :  { %3572 = vtanh.f32 %v4295_v16 }
 0x19a   :  { %3574 = vrcp.f32 %v688_v50 }
 0x1a3   :  { %v3573_v51 = vpop.eup %3572 }
 0x1a4   :  { %v3575_v43 = vpop.eup %3574 }
 0x1a5   :  { %v695_v28 = vmul.f32 %v3575_v43, %v3573_v51 }
 0x1a7   :  { %v696_v44 = vpack.c.bf16 %v695_v28, %v695_v28 }
 0x1a9   :  { %697 = vst [vmem:[#allocation5] sm:$0xf] %v696_v44  ;;  %928 = vmatmul.mubr.bf16.vlgmr.msra.gmra.mrb[16].mxu0 %v696_v44  ;;  %969 = vmatmul.mubr.bf16.vlgmr.msra.gmra.mrb[24].mxu1 %v696_v44 }
 0x1aa   :  { %1202 = vmatpush1.bf16.msra.mxu0 %v4062_v4  ;;  %1243 = vmatpush1.bf16.msra.mxu1 %v4129_v27 }
 0x1ab   :  { %1203 = vmatprep.subr.bf16.mxu0 %v4066_v6  ;;  %1244 = vmatprep.subr.bf16.mxu1 %v4132_v29 }
 0x1ac   :  { %1233 = vmatprep.mubr.bf16.mxu0 %v4688_v9  ;;  %1274 = vmatprep.mubr.bf16.mxu1 %v4688_v9 }
 0x1ae   :  { %1204 = vmatpush1.bf16.msra.mxu0 %v4071_v7  ;;  %1245 = vmatpush1.bf16.msra.mxu1 %v4138_v30 }
 0x1af   :  { %1205 = vmatprep.subr.bf16.mxu0 %v4075_v8  ;;  %1246 = vmatprep.subr.bf16.mxu1 %v4141_v31 }
 0x1b2   :  { %1206 = vmatpush1.bf16.msra.mxu0 %v4078_v10  ;;  %1247 = vmatpush1.bf16.msra.mxu1 %v4148_v32 }
 0x1b3   :  { %1207 = vmatprep.subr.bf16.mxu0 %v4081_v11  ;;  %1248 = vmatprep.subr.bf16.mxu1 %v4151_v33 }
 0x1b6   :  { %1208 = vmatpush1.bf16.msra.mxu0 %v4084_v12  ;;  %1249 = vmatpush1.bf16.msra.mxu1 %v4161_v34 }
 0x1b7   :  { %1209 = vmatprep.subr.bf16.mxu0 %v4089_v15  ;;  %1250 = vmatprep.subr.bf16.mxu1 %v4165_v35 }
 0x1ba   :  { %1210 = vmatpush1.bf16.msra.mxu0 %v4092_v17  ;;  %1251 = vmatpush1.bf16.msra.mxu1 %v4169_v36 }
 0x1bb   :  { %1211 = vmatprep.subr.bf16.mxu0 %v4096_v18  ;;  %1252 = vmatprep.subr.bf16.mxu1 %v4173_v37 }
 0x1be   :  { %1212 = vmatpush1.bf16.msra.mxu0 %v4102_v19  ;;  %1253 = vmatpush1.bf16.msra.mxu1 %v4176_v38 }
 0x1bf   :  { %1213 = vmatprep.subr.bf16.mxu0 %v4106_v20  ;;  %1254 = vmatprep.subr.bf16.mxu1 %v4179_v39 }
 0x1c2   :  { %1214 = vmatpush1.bf16.msra.mxu0 %v4112_v22  ;;  %1255 = vmatpush1.bf16.msra.mxu1 %v4182_v40 }
 0x1c3   :  { %1215 = vmatprep.subr.bf16.mxu0 %v4116_v23  ;;  %1256 = vmatprep.subr.bf16.mxu1 %v4185_v41 }
 0x1c6   :  { %1216 = vmatpush1.bf16.msra.mxu0 %v4118_v24  ;;  %1257 = vmatpush1.bf16.msra.mxu1 %v4188_v42 }
 0x1c7   :  { %1507 = vmatprep.subr.bf16.mxu0 %v4064_v5  ;;  %1548 = vmatprep.subr.bf16.mxu1 %v4122_v26 }
 0x27c   :  { %v929_v15 = vpop.f32.mrb[16].mxu0  ;;  %v970_v17 = vpop.f32.mrb[24].mxu1 }
 0x27d   :  { %v930_v18 = vadd.f32 %v929_v15, %v4245_v47  ;;  %v971_v19 = vadd.f32 %v970_v17, %v4222_v53  ;;  %v931_v20 = vpop.f32.mrb[17].mxu0  ;;  %v972_v22 = vpop.f32.mrb[25].mxu1 }
 0x27e   :  { %v932_v23 = vadd.f32 %v931_v20, %v4250_v56  ;;  %v973_v3 = vadd.f32 %v972_v22, %v4225_v55  ;;  %v933_v62 = vpop.f32.mrb[18].mxu0  ;;  %v974_v24 = vpop.f32.mrb[26].mxu1 }
 0x27f   :  { %v3152_v63 = vmul.f32 -1.442695, %v930_v18  ;;  %v934_v13 = vpop.f32.mrb[19].mxu0  ;;  %v975_v25 = vpop.f32.mrb[27].mxu1 }
 0x280   :  { %v3153_v5 = vmul.f32 -1.442695, %v932_v23  ;;  %v3154_v26 = vmul.f32 -1.442695, %v973_v3  ;;  %v4398_v25 = vld [vmem:[#allocation14 + $0x4] ss:$16 sps:$4 sm:$0xff]  }
 0x281   :  { %3576 = vpow2.f32 %v3152_v63 }
 0x282   :  { %3578 = vpow2.f32 %v3153_v5  ;;  %v4400_v5 = vld [vmem:[#allocation14 + $0xc] ss:$16 sps:$4 sm:$0xff]  }
 0x283   :  { %3580 = vpow2.f32 %v3154_v26  ;;  %v4402_v26 = vld [vmem:[#allocation14] ss:$16 sps:$4 sm:$0xff]  }
 0x284   :  { %3582 = vtanh.f32 %v971_v19 }
 0x28b   :  { %v3577_v52 = vpop.eup %3576 }
 0x28c   :  { %v3579_v45 = vpop.eup %3578  ;;  %v980_v47 = vadd.f32 1.0, %v3577_v52  ;;  %v4404_v52 = vld [vmem:[#allocation14 + $0x8] ss:$16 sps:$4 sm:$0xff]  }
 0x28d   :  { %v986_v53 = vadd.f32 1.0, %v3579_v45  ;;  %v3581_v56 = vpop.eup %3580  ;;  %v4410_v45 = vld [vmem:[#allocation14 + $0x24] ss:$16 sps:$4 sm:$0xff]  }
 0x28e   :  { %3584 = vrcp.f32 %v980_v47  ;;  %v3583_v2 = vpop.eup %3582  ;;  %v993_v0 = vadd.f32 1.0, %v3581_v56  ;;  %v4412_v47 = vld [vmem:[#allocation14 + $0x2c] ss:$16 sps:$4 sm:$0xff]   ;;  %v4416_v56 = vld [vmem:[#allocation14 + $0x28] ss:$16 sps:$4 sm:$0xff]  }
 0x28f   :  { %3586 = vrcp.f32 %v986_v53  ;;  %v4414_v53 = vld [vmem:[#allocation14 + $0x20] ss:$16 sps:$4 sm:$0xff]  }
 0x290   :  { %3588 = vrcp.f32 %v993_v0  ;;  %v4434_v0 = vld [vmem:[#allocation14 + $0x64] ss:$16 sps:$4 sm:$0xff]  }
 0x298   :  { %v3585_v55 = vpop.eup %3584 }
 0x299   :  { %v3587_v1 = vpop.eup %3586  ;;  %v997_v58 = vmul.f32 %v3585_v55, %v3583_v2  ;;  %v4422_v2 = vld [vmem:[#allocation14 + $0x44] ss:$16 sps:$4 sm:$0xff]   ;;  %v4424_v55 = vld [vmem:[#allocation14 + $0x4c] ss:$16 sps:$4 sm:$0xff]  }
 0x29a   :  { %v996_v54 = vmul.f32 %v3587_v1, %v4295_v16  ;;  %v3589_v49 = vpop.eup %3588  ;;  %v4426_v1 = vld [vmem:[#allocation14 + $0x40] ss:$16 sps:$4 sm:$0xff]  }
 0x29c   :  { %v4337_v48 = vadd.f32 %v997_v58, %v996_v54  ;;  %v4428_v58 = vld [vmem:[#allocation14 + $0x48] ss:$16 sps:$4 sm:$0xff]   ;;  %v4436_v54 = vld [vmem:[#allocation14 + $0x6c] ss:$16 sps:$4 sm:$0xff]  }
 0x29e   :  { %3590 = vtanh.f32 %v4337_v48 }
 0x2a8   :  { %v3591_v50 = vpop.eup %3590 }
 0x2a9   :  { %v1000_v51 = vmul.f32 %v3591_v50, %v3589_v49  ;;  %v4440_v49 = vld [vmem:[#allocation14 + $0x68] ss:$16 sps:$4 sm:$0xff]  }
 0x2aa   :  { %v4447_v50 = vld [vmem:[#allocation14 + $0x88] ss:$16 sps:$4 sm:$0xff]  }
 0x2ab   :  { %v1001_v43 = vpack.c.bf16 %v1000_v51, %v1000_v51  ;;  %v4449_v51 = vld [vmem:[#allocation14 + $0x8c] ss:$16 sps:$4 sm:$0xff]  }
 0x2ad   :  { %1003 = vst [vmem:[#allocation5 + $0x4] sm:$0xf] %v1001_v43  ;;  %1234 = vmatmul.mubr.bf16.vlgmr.msra.gmra.mrb[20].mxu0 %v1001_v43  ;;  %1275 = vmatmul.mubr.bf16.vlgmr.msra.gmra.mrb[28].mxu1 %v1001_v43  ;;  %v4451_v43 = vld [vmem:[#allocation14 + $0xac] ss:$16 sps:$4 sm:$0xff]  }
 0x2ae   :  { %1508 = vmatpush1.bf16.msra.mxu0 %v4062_v4  ;;  %1549 = vmatpush1.bf16.msra.mxu1 %v4129_v27  ;;  %v4364_v4 = vld [vmem:[#allocation14 + $0x80] ss:$16 sps:$4 sm:$0xff]  }
 0x2af   :  { %1509 = vmatprep.subr.bf16.mxu0 %v4066_v6  ;;  %1550 = vmatprep.subr.bf16.mxu1 %v4132_v29  ;;  %v4366_v6 = vld [vmem:[#allocation14 + $0x84] ss:$16 sps:$4 sm:$0xff]   ;;  %v4384_v27 = vld [vmem:[#allocation14 + $0xe0] ss:$16 sps:$4 sm:$0xff]  }
 0x2b0   :  { %1539 = vmatprep.mubr.bf16.mxu0 %v4688_v9  ;;  %1580 = vmatprep.mubr.bf16.mxu1 %v4688_v9 }
 0x2b2   :  { %1510 = vmatpush1.bf16.msra.mxu0 %v4071_v7  ;;  %1551 = vmatpush1.bf16.msra.mxu1 %v4138_v30  ;;  %v4368_v7 = vld [vmem:[#allocation14 + $0xa4] ss:$16 sps:$4 sm:$0xff]  }
 0x2b3   :  { %1511 = vmatprep.subr.bf16.mxu0 %v4075_v8  ;;  %1552 = vmatprep.subr.bf16.mxu1 %v4141_v31  ;;  %v4372_v8 = vld [vmem:[#allocation14 + $0xa0] ss:$16 sps:$4 sm:$0xff]  }
 0x2b6   :  { %1512 = vmatpush1.bf16.msra.mxu0 %v4078_v10  ;;  %1553 = vmatpush1.bf16.msra.mxu1 %v4148_v32  ;;  %v4375_v10 = vld [vmem:[#allocation14 + $0xc4] ss:$16 sps:$4 sm:$0xff]  }
 0x2b7   :  { %1513 = vmatprep.subr.bf16.mxu0 %v4081_v11  ;;  %1554 = vmatprep.subr.bf16.mxu1 %v4151_v33  ;;  %v4378_v11 = vld [vmem:[#allocation14 + $0xc0] ss:$16 sps:$4 sm:$0xff]  }
 0x2ba   :  { %1514 = vmatpush1.bf16.msra.mxu0 %v4084_v12  ;;  %1555 = vmatpush1.bf16.msra.mxu1 %v4161_v34  ;;  %v4381_v12 = vld [vmem:[#allocation14 + $0xe4] ss:$16 sps:$4 sm:$0xff]  }
 0x2bb   :  { %1556 = vmatprep.subr.bf16.mxu1 %v4165_v35  ;;  %1515 = vmatprep.subr.bf16.mxu0 %v4366_v6 }
 0x2be   :  { %1557 = vmatpush1.bf16.msra.mxu1 %v4169_v36  ;;  %1516 = vmatpush1.bf16.msra.mxu0 %v4364_v4  ;;  %v4689_v36 = vld [vmem:[#allocation27_spill] sm:$0xff] }
 0x2bf   :  { %1558 = vmatprep.subr.bf16.mxu1 %v4173_v37  ;;  %1517 = vmatprep.subr.bf16.mxu0 %v4368_v7 }
 0x2c2   :  { %1559 = vmatpush1.bf16.msra.mxu1 %v4176_v38  ;;  %1518 = vmatpush1.bf16.msra.mxu0 %v4372_v8 }
 0x2c3   :  { %1560 = vmatprep.subr.bf16.mxu1 %v4179_v39  ;;  %1519 = vmatprep.subr.bf16.mxu0 %v4375_v10 }
 0x2c6   :  { %1561 = vmatpush1.bf16.msra.mxu1 %v4182_v40  ;;  %1520 = vmatpush1.bf16.msra.mxu0 %v4378_v11 }
 0x2c7   :  { %1562 = vmatprep.subr.bf16.mxu1 %v4185_v41  ;;  %1521 = vmatprep.subr.bf16.mxu0 %v4381_v12 }
 0x2ca   :  { %1563 = vmatpush1.bf16.msra.mxu1 %v4188_v42  ;;  %1522 = vmatpush1.bf16.msra.mxu0 %v4384_v27 }
 0x2cb   :  { %1813 = vmatprep.subr.bf16.mxu0 %v4398_v25  ;;  %1854 = vmatprep.subr.bf16.mxu1 %v4400_v5 }
 0x380   :  { %v1235_v29 = vpop.f32.mrb[20].mxu0  ;;  %v1276_v30 = vpop.f32.mrb[28].mxu1 }
 0x381   :  { %v1236_v31 = vadd.f32 %v1235_v29, %v4255_v46  ;;  %v1277_v32 = vadd.f32 %v1276_v30, %v4228_v57  ;;  %v1237_v33 = vpop.f32.mrb[21].mxu0  ;;  %v1278_v34 = vpop.f32.mrb[29].mxu1  ;;  %v4456_v29 = vld [vmem:[#allocation14 + $0xa8] ss:$16 sps:$4 sm:$0xff]   ;;  %v4460_v30 = vld [vmem:[#allocation14 + $0xcc] ss:$16 sps:$4 sm:$0xff]  }
 0x382   :  { %v1238_v35 = vadd.f32 %v1237_v33, %v4260_v21  ;;  %v1279_v37 = vadd.f32 %v1278_v34, %v4689_v36  ;;  %v1239_v38 = vpop.f32.mrb[22].mxu0  ;;  %v1280_v39 = vpop.f32.mrb[30].mxu1  ;;  %v4472_v33 = vld [vmem:[#allocation14 + $0xe8] ss:$16 sps:$4 sm:$0xff]  }
 0x383   :  { %v3187_v40 = vmul.f32 -1.442695, %v1236_v31  ;;  %v1240_v41 = vpop.f32.mrb[23].mxu0  ;;  %v1281_v42 = vpop.f32.mrb[31].mxu1  ;;  %v4464_v31 = vld [vmem:[#allocation14 + $0xc8] ss:$16 sps:$4 sm:$0xff]  }
 0x384   :  { %v3188_v16 = vmul.f32 -1.442695, %v1238_v35  ;;  %v3189_v28 = vmul.f32 -1.442695, %v1279_v37  ;;  %v4690_v36 = vld [vmem:[#allocation36_spill] sm:$0xff]  ;;  %v4692_v42 = vld [vmem:[#allocation38_spill] sm:$0xff] }
 0x385   :  { %3592 = vpow2.f32 %v3187_v40  ;;  %v4691_v38 = vld [vmem:[#allocation28_spill] sm:$0xff] }
 0x386   :  { %3594 = vpow2.f32 %v3188_v16 }
 0x387   :  { %3596 = vpow2.f32 %v3189_v28  ;;  %v4693_v28 = vld [vmem:[#allocation29_spill] sm:$0xff] }
 0x388   :  { %3598 = vtanh.f32 %v1277_v32  ;;  %v4468_v32 = vld [vmem:[#allocation14 + $0xec] ss:$16 sps:$4 sm:$0xff]  }
 0x38f   :  { %v3593_v44 = vpop.eup %3592 }
 0x390   :  { %v3595_v15 = vpop.eup %3594  ;;  %v1286_v46 = vadd.f32 1.0, %v3593_v44 }
 0x391   :  { %v1292_v57 = vadd.f32 1.0, %v3595_v15  ;;  %v3597_v21 = vpop.eup %3596 }
 0x392   :  { %3600 = vrcp.f32 %v1286_v46  ;;  %v3599_v17 = vpop.eup %3598  ;;  %v1299_v22 = vadd.f32 1.0, %v3597_v21 }
 0x393   :  { %3602 = vrcp.f32 %v1292_v57 }
 0x394   :  { %3604 = vrcp.f32 %v1299_v22 }
 0x39c   :  { %v3601_v18 = vpop.eup %3600 }
 0x39d   :  { %v3603_v19 = vpop.eup %3602  ;;  %v1303_v20 = vmul.f32 %v3601_v18, %v3599_v17 }
 0x39e   :  { %v1302_v23 = vmul.f32 %v3603_v19, %v4337_v48  ;;  %v3605_v62 = vpop.eup %3604  ;;  %v4438_v48 = vld [vmem:[#allocation14 + $0x60] ss:$16 sps:$4 sm:$0xff]  }
 0x3a0   :  { %v4393_v3 = vadd.f32 %v1303_v20, %v1302_v23 }
 0x3a2   :  { %3606 = vtanh.f32 %v4393_v3 }
 0x3ac   :  { %v3607_v24 = vpop.eup %3606 }
 0x3ad   :  { %v1306_v63 = vmul.f32 %v3607_v24, %v3605_v62 }
 0x3af   :  { %v1307_v13 = vpack.c.bf16 %v1306_v63, %v1306_v63 }
 0x3b1   :  { %1309 = vst [vmem:[#allocation5 + $0x8] sm:$0xf] %v1307_v13  ;;  %1540 = vmatmul.mubr.bf16.vlgmr.msra.gmra.mrb[24].mxu0 %v1307_v13  ;;  %1581 = vmatmul.mubr.bf16.vlgmr.msra.gmra.mrb[32].mxu1 %v1307_v13 }
 0x3b2   :  { %1845 = vmatprep.mubr.bf16.mxu0 %v4688_v9  ;;  %1886 = vmatprep.mubr.bf16.mxu1 %v4688_v9 }
 0x3b3   :  { %1814 = vmatpush1.bf16.msra.mxu0 %v4402_v26  ;;  %1855 = vmatpush1.bf16.msra.mxu1 %v4404_v52 }
 0x3b4   :  { %1815 = vmatprep.subr.bf16.mxu0 %v4410_v45  ;;  %1856 = vmatprep.subr.bf16.mxu1 %v4412_v47 }
 0x3b7   :  { %1816 = vmatpush1.bf16.msra.mxu0 %v4414_v53  ;;  %1857 = vmatpush1.bf16.msra.mxu1 %v4416_v56 }
 0x3b8   :  { %1817 = vmatprep.subr.bf16.mxu0 %v4422_v2  ;;  %1858 = vmatprep.subr.bf16.mxu1 %v4424_v55 }
 0x3bb   :  { %1818 = vmatpush1.bf16.msra.mxu0 %v4426_v1  ;;  %1859 = vmatpush1.bf16.msra.mxu1 %v4428_v58 }
 0x3bc   :  { %1819 = vmatprep.subr.bf16.mxu0 %v4434_v0  ;;  %1860 = vmatprep.subr.bf16.mxu1 %v4436_v54 }
 0x3bf   :  { %1820 = vmatpush1.bf16.msra.mxu0 %v4438_v48  ;;  %1861 = vmatpush1.bf16.msra.mxu1 %v4440_v49 }
 0x3c0   :  { %1821 = vmatprep.subr.bf16.mxu0 %v4366_v6  ;;  %1862 = vmatprep.subr.bf16.mxu1 %v4449_v51 }
 0x3c3   :  { %1822 = vmatpush1.bf16.msra.mxu0 %v4364_v4  ;;  %1863 = vmatpush1.bf16.msra.mxu1 %v4447_v50 }
 0x3c4   :  { %1823 = vmatprep.subr.bf16.mxu0 %v4368_v7  ;;  %1864 = vmatprep.subr.bf16.mxu1 %v4451_v43 }
 0x3c7   :  { %1824 = vmatpush1.bf16.msra.mxu0 %v4372_v8  ;;  %1865 = vmatpush1.bf16.msra.mxu1 %v4456_v29 }
 0x3c8   :  { %1825 = vmatprep.subr.bf16.mxu0 %v4375_v10  ;;  %1866 = vmatprep.subr.bf16.mxu1 %v4460_v30 }
 0x3cb   :  { %1826 = vmatpush1.bf16.msra.mxu0 %v4378_v11  ;;  %1867 = vmatpush1.bf16.msra.mxu1 %v4464_v31 }
 0x3cc   :  { %1827 = vmatprep.subr.bf16.mxu0 %v4381_v12  ;;  %1868 = vmatprep.subr.bf16.mxu1 %v4468_v32 }
 0x3cf   :  { %1828 = vmatpush1.bf16.msra.mxu0 %v4384_v27  ;;  %1869 = vmatpush1.bf16.msra.mxu1 %v4472_v33 }
 0x3d0   :  { %2119 = vmatprep.subr.bf16.mxu0 %v4398_v25  ;;  %2160 = vmatprep.subr.bf16.mxu1 %v4400_v5 }
 0x484   :  { %v1541_v34 = vpop.f32.mrb[24].mxu0  ;;  %v1582_v35 = vpop.f32.mrb[32].mxu1 }
 0x485   :  { %v1542_v37 = vadd.f32 %v1541_v34, %v4690_v36  ;;  %v1583_v39 = vadd.f32 %v1582_v35, %v4691_v38  ;;  %v1543_v40 = vpop.f32.mrb[25].mxu0  ;;  %v1584_v41 = vpop.f32.mrb[33].mxu1 }
 0x486   :  { %v1544_v16 = vadd.f32 %v1543_v40, %v4692_v42  ;;  %v1585_v44 = vadd.f32 %v1584_v41, %v4693_v28  ;;  %v1545_v15 = vpop.f32.mrb[26].mxu0  ;;  %v1586_v46 = vpop.f32.mrb[34].mxu1  ;;  %v4694_v28 = vld [vmem:[#allocation40_spill] sm:$0xff] }
 0x487   :  { %v3222_v57 = vmul.f32 -1.442695, %v1542_v37  ;;  %v1546_v21 = vpop.f32.mrb[27].mxu0  ;;  %v1587_v17 = vpop.f32.mrb[35].mxu1  ;;  %v4695_v15 = vld [vmem:[#allocation30_spill] sm:$0xff] }
 0x488   :  { %v3223_v18 = vmul.f32 -1.442695, %v1544_v16  ;;  %v3224_v19 = vmul.f32 -1.442695, %v1585_v44 }
 0x489   :  { %3608 = vpow2.f32 %v3222_v57 }
 0x48a   :  { %3610 = vpow2.f32 %v3223_v18  ;;  %v4696_v18 = vld [vmem:[#allocation31_spill] sm:$0xff] }
 0x48b   :  { %3612 = vpow2.f32 %v3224_v19 }
 0x48c   :  { %3614 = vtanh.f32 %v1583_v39 }
 0x493   :  { %v3609_v20 = vpop.eup %3608 }
 0x494   :  { %v3611_v22 = vpop.eup %3610  ;;  %v1592_v23 = vadd.f32 1.0, %v3609_v20 }
 0x495   :  { %v1598_v62 = vadd.f32 1.0, %v3611_v22  ;;  %v3613_v24 = vpop.eup %3612 }
 0x496   :  { %3616 = vrcp.f32 %v1592_v23  ;;  %v3615_v63 = vpop.eup %3614  ;;  %v1605_v36 = vadd.f32 1.0, %v3613_v24 }
 0x497   :  { %3618 = vrcp.f32 %v1598_v62 }
 0x498   :  { %3620 = vrcp.f32 %v1605_v36 }
 0x4a0   :  { %v3617_v13 = vpop.eup %3616 }
 0x4a1   :  { %v3619_v34 = vpop.eup %3618  ;;  %v1609_v35 = vmul.f32 %v3617_v13, %v3615_v63 }
 0x4a2   :  { %v1608_v37 = vmul.f32 %v3619_v34, %v4393_v3  ;;  %v3621_v40 = vpop.eup %3620 }
 0x4a4   :  { %v4485_v38 = vadd.f32 %v1609_v35, %v1608_v37 }
 0x4a6   :  { %3622 = vtanh.f32 %v4485_v38 }
 0x4b0   :  { %v3623_v41 = vpop.eup %3622 }
 0x4b1   :  { %v1612_v42 = vmul.f32 %v3623_v41, %v3621_v40 }
 0x4b3   :  { %v1613_v39 = vpack.c.bf16 %v1612_v42, %v1612_v42 }
 0x4b5   :  { %1615 = vst [vmem:[#allocation5 + $0xc] sm:$0xf] %v1613_v39  ;;  %1846 = vmatmul.mubr.bf16.vlgmr.msra.gmra.mrb[28].mxu0 %v1613_v39  ;;  %1887 = vmatmul.mubr.bf16.vlgmr.msra.gmra.mrb[36].mxu1 %v1613_v39 }
 0x4b6   :  { %2120 = vmatpush1.bf16.msra.mxu0 %v4402_v26  ;;  %2161 = vmatpush1.bf16.msra.mxu1 %v4404_v52 }
 0x4b7   :  { %2121 = vmatprep.subr.bf16.mxu0 %v4410_v45  ;;  %2162 = vmatprep.subr.bf16.mxu1 %v4412_v47 }
 0x4b8   :  { %2151 = vmatprep.mubr.bf16.mxu0 %v4688_v9  ;;  %2192 = vmatprep.mubr.bf16.mxu1 %v4688_v9 }
 0x4ba   :  { %2122 = vmatpush1.bf16.msra.mxu0 %v4414_v53  ;;  %2163 = vmatpush1.bf16.msra.mxu1 %v4416_v56 }
 0x4bb   :  { %2123 = vmatprep.subr.bf16.mxu0 %v4422_v2  ;;  %2164 = vmatprep.subr.bf16.mxu1 %v4424_v55 }
 0x4be   :  { %2124 = vmatpush1.bf16.msra.mxu0 %v4426_v1  ;;  %2165 = vmatpush1.bf16.msra.mxu1 %v4428_v58 }
 0x4bf   :  { %2125 = vmatprep.subr.bf16.mxu0 %v4434_v0  ;;  %2166 = vmatprep.subr.bf16.mxu1 %v4436_v54 }
 0x4c2   :  { %2126 = vmatpush1.bf16.msra.mxu0 %v4438_v48  ;;  %2167 = vmatpush1.bf16.msra.mxu1 %v4440_v49 }
 0x4c3   :  { %2127 = vmatprep.subr.bf16.mxu0 %v4366_v6  ;;  %2168 = vmatprep.subr.bf16.mxu1 %v4449_v51 }
 0x4c6   :  { %2128 = vmatpush1.bf16.msra.mxu0 %v4364_v4  ;;  %2169 = vmatpush1.bf16.msra.mxu1 %v4447_v50 }
 0x4c7   :  { %2129 = vmatprep.subr.bf16.mxu0 %v4368_v7  ;;  %2170 = vmatprep.subr.bf16.mxu1 %v4451_v43 }
 0x4ca   :  { %2130 = vmatpush1.bf16.msra.mxu0 %v4372_v8  ;;  %2171 = vmatpush1.bf16.msra.mxu1 %v4456_v29 }
 0x4cb   :  { %2131 = vmatprep.subr.bf16.mxu0 %v4375_v10  ;;  %2172 = vmatprep.subr.bf16.mxu1 %v4460_v30 }
 0x4ce   :  { %2132 = vmatpush1.bf16.msra.mxu0 %v4378_v11  ;;  %2173 = vmatpush1.bf16.msra.mxu1 %v4464_v31 }
 0x4cf   :  { %2133 = vmatprep.subr.bf16.mxu0 %v4381_v12  ;;  %2174 = vmatprep.subr.bf16.mxu1 %v4468_v32 }
 0x4d2   :  { %2134 = vmatpush1.bf16.msra.mxu0 %v4384_v27  ;;  %2175 = vmatpush1.bf16.msra.mxu1 %v4472_v33 }
 0x4d3   :  { %2425 = vmatprep.subr.bf16.mxu0 %v4398_v25  ;;  %2466 = vmatprep.subr.bf16.mxu1 %v4400_v5 }
 0x588   :  { %v1847_v3 = vpop.f32.mrb[28].mxu0  ;;  %v1888_v16 = vpop.f32.mrb[36].mxu1 }
 0x589   :  { %v1848_v44 = vadd.f32 %v1847_v3, %v4694_v28  ;;  %v1889_v46 = vadd.f32 %v1888_v16, %v4695_v15  ;;  %v1849_v57 = vpop.f32.mrb[29].mxu0  ;;  %v1890_v21 = vpop.f32.mrb[37].mxu1 }
 0x58a   :  { %v1850_v17 = vadd.f32 %v1849_v57, %v4277_v61  ;;  %v1891_v19 = vadd.f32 %v1890_v21, %v4696_v18  ;;  %v1851_v20 = vpop.f32.mrb[30].mxu0  ;;  %v1892_v22 = vpop.f32.mrb[38].mxu1  ;;  %v4698_v21 = vld [vmem:[#allocation33_spill] sm:$0xff] }
 0x58b   :  { %v3257_v23 = vmul.f32 -1.442695, %v1848_v44  ;;  %v1852_v62 = vpop.f32.mrb[31].mxu0  ;;  %v1893_v24 = vpop.f32.mrb[39].mxu1 }
 0x58c   :  { %v3258_v63 = vmul.f32 -1.442695, %v1850_v17  ;;  %v3259_v13 = vmul.f32 -1.442695, %v1891_v19 }
 0x58d   :  { %3624 = vpow2.f32 %v3257_v23 }
 0x58e   :  { %3626 = vpow2.f32 %v3258_v63 }
 0x58f   :  { %3628 = vpow2.f32 %v3259_v13 }
 0x590   :  { %3630 = vtanh.f32 %v1889_v46 }
 0x597   :  { %v3625_v34 = vpop.eup %3624 }
 0x598   :  { %v3627_v35 = vpop.eup %3626  ;;  %v1898_v36 = vadd.f32 1.0, %v3625_v34 }
 0x599   :  { %v1904_v37 = vadd.f32 1.0, %v3627_v35  ;;  %v3629_v61 = vpop.eup %3628 }
 0x59a   :  { %3632 = vrcp.f32 %v1898_v36  ;;  %v3631_v40 = vpop.eup %3630  ;;  %v1911_v3 = vadd.f32 1.0, %v3629_v61 }
 0x59b   :  { %3634 = vrcp.f32 %v1904_v37 }
 0x59c   :  { %3636 = vrcp.f32 %v1911_v3 }
 0x5a4   :  { %v3633_v41 = vpop.eup %3632 }
 0x5a5   :  { %v3635_v42 = vpop.eup %3634  ;;  %v1915_v39 = vmul.f32 %v3633_v41, %v3631_v40 }
 0x5a6   :  { %v1914_v16 = vmul.f32 %v3635_v42, %v4485_v38  ;;  %v3637_v44 = vpop.eup %3636 }
 0x5a8   :  { %v4527_v28 = vadd.f32 %v1915_v39, %v1914_v16 }
 0x5aa   :  { %3638 = vtanh.f32 %v4527_v28 }
 0x5b4   :  { %v3639_v15 = vpop.eup %3638 }
 0x5b5   :  { %v1918_v57 = vmul.f32 %v3639_v15, %v3637_v44 }
 0x5b7   :  { %v1919_v46 = vpack.c.bf16 %v1918_v57, %v1918_v57 }
 0x5b9   :  { %1921 = vst [vmem:[#allocation5 + $0x10] sm:$0xf] %v1919_v46  ;;  %2152 = vmatmul.mubr.bf16.vlgmr.msra.gmra.mrb[32].mxu0 %v1919_v46  ;;  %2193 = vmatmul.mubr.bf16.vlgmr.msra.gmra.mrb[40].mxu1 %v1919_v46 }
 0x5ba   :  { %2426 = vmatpush1.bf16.msra.mxu0 %v4402_v26  ;;  %2467 = vmatpush1.bf16.msra.mxu1 %v4404_v52 }
 0x5bb   :  { %2427 = vmatprep.subr.bf16.mxu0 %v4410_v45  ;;  %2468 = vmatprep.subr.bf16.mxu1 %v4412_v47 }
 0x5bc   :  { %2457 = vmatprep.mubr.bf16.mxu0 %v4688_v9  ;;  %2498 = vmatprep.mubr.bf16.mxu1 %v4688_v9 }
 0x5be   :  { %2428 = vmatpush1.bf16.msra.mxu0 %v4414_v53  ;;  %2469 = vmatpush1.bf16.msra.mxu1 %v4416_v56 }
 0x5bf   :  { %2429 = vmatprep.subr.bf16.mxu0 %v4422_v2  ;;  %2470 = vmatprep.subr.bf16.mxu1 %v4424_v55 }
 0x5c2   :  { %2430 = vmatpush1.bf16.msra.mxu0 %v4426_v1  ;;  %2471 = vmatpush1.bf16.msra.mxu1 %v4428_v58 }
 0x5c3   :  { %2431 = vmatprep.subr.bf16.mxu0 %v4434_v0  ;;  %2472 = vmatprep.subr.bf16.mxu1 %v4436_v54 }
 0x5c6   :  { %2432 = vmatpush1.bf16.msra.mxu0 %v4438_v48  ;;  %2473 = vmatpush1.bf16.msra.mxu1 %v4440_v49 }
 0x5c7   :  { %2433 = vmatprep.subr.bf16.mxu0 %v4366_v6  ;;  %2474 = vmatprep.subr.bf16.mxu1 %v4449_v51 }
 0x5ca   :  { %2434 = vmatpush1.bf16.msra.mxu0 %v4364_v4  ;;  %2475 = vmatpush1.bf16.msra.mxu1 %v4447_v50 }
 0x5cb   :  { %2435 = vmatprep.subr.bf16.mxu0 %v4368_v7  ;;  %2476 = vmatprep.subr.bf16.mxu1 %v4451_v43 }
 0x5ce   :  { %2436 = vmatpush1.bf16.msra.mxu0 %v4372_v8  ;;  %2477 = vmatpush1.bf16.msra.mxu1 %v4456_v29  ;;  %v4697_v8 = vld [vmem:[#allocation32_spill] sm:$0xff] }
 0x5cf   :  { %2437 = vmatprep.subr.bf16.mxu0 %v4375_v10  ;;  %2478 = vmatprep.subr.bf16.mxu1 %v4460_v30 }
 0x5d2   :  { %2438 = vmatpush1.bf16.msra.mxu0 %v4378_v11  ;;  %2479 = vmatpush1.bf16.msra.mxu1 %v4464_v31 }
 0x5d3   :  { %2439 = vmatprep.subr.bf16.mxu0 %v4381_v12  ;;  %2480 = vmatprep.subr.bf16.mxu1 %v4468_v32 }
 0x5d6   :  { %2440 = vmatpush1.bf16.msra.mxu0 %v4384_v27  ;;  %2481 = vmatpush1.bf16.msra.mxu1 %v4472_v33 }
 0x5d7   :  { %2731 = vmatprep.subr.bf16.mxu0 %v4398_v25  ;;  %2772 = vmatprep.subr.bf16.mxu1 %v4400_v5 }
 0x68c   :  { %v2153_v4 = vpop.f32.mrb[32].mxu0  ;;  %v2194_v6 = vpop.f32.mrb[40].mxu1 }
 0x68d   :  { %v2154_v7 = vadd.f32 %v2153_v4, %v4279_v59  ;;  %v2195_v10 = vadd.f32 %v2194_v6, %v4697_v8  ;;  %v2155_v11 = vpop.f32.mrb[33].mxu0  ;;  %v2196_v38 = vpop.f32.mrb[41].mxu1 }
 0x68e   :  { %v2156_v12 = vadd.f32 %v2155_v11, %v4281_v60  ;;  %v2197_v17 = vadd.f32 %v2196_v38, %v4698_v21  ;;  %v2157_v18 = vpop.f32.mrb[34].mxu0  ;;  %v2198_v27 = vpop.f32.mrb[42].mxu1 }
 0x68f   :  { %v3292_v19 = vmul.f32 -1.442695, %v2154_v7  ;;  %v2158_v20 = vpop.f32.mrb[35].mxu0  ;;  %v2199_v22 = vpop.f32.mrb[43].mxu1 }
 0x690   :  { %v3293_v25 = vmul.f32 -1.442695, %v2156_v12  ;;  %v3294_v5 = vmul.f32 -1.442695, %v2197_v17  ;;  %v3549_v20 = vld [vmem:[#allocation5] sm:$0xff]  }
 0x691   :  { %3640 = vpow2.f32 %v3292_v19  ;;  %v3550_v19 = vld [vmem:[#allocation15 + $0x8] sm:$0xff]   ;;  %v3551_v22 = vld [vmem:[#allocation15 + $0x10] sm:$0xff]  }
 0x692   :  { %3642 = vpow2.f32 %v3293_v25  ;;  %v3552_v25 = vld [vmem:[#allocation15 + $0x18] sm:$0xff]  }
 0x693   :  { %3644 = vpow2.f32 %v3294_v5  ;;  %v3553_v5 = vld [vmem:[#allocation15 + $0x20] sm:$0xff]  }
 0x694   :  { %3646 = vtanh.f32 %v2195_v10 }
 0x69b   :  { %v3641_v23 = vpop.eup %3640 }
 0x69c   :  { %v3643_v62 = vpop.eup %3642  ;;  %v2204_v59 = vadd.f32 1.0, %v3641_v23  ;;  %v3554_v23 = vld [vmem:[#allocation15 + $0x28] sm:$0xff]  }
 0x69d   :  { %v2210_v24 = vadd.f32 1.0, %v3643_v62  ;;  %v3645_v60 = vpop.eup %3644  ;;  %v3555_v62 = vld [vmem:[#allocation15 + $0x30] sm:$0xff]  }
 0x69e   :  { %3648 = vrcp.f32 %v2204_v59  ;;  %v3647_v63 = vpop.eup %3646  ;;  %v2217_v36 = vadd.f32 1.0, %v3645_v60  ;;  %v3556_v59 = vld [vmem:[#allocation15 + $0x38] sm:$0xff]  }
 0x69f   :  { %3650 = vrcp.f32 %v2210_v24  ;;  %v3557_v24 = vld [vmem:[#allocation5 + $0x8] sm:$0xff]  }
 0x6a0   :  { %3652 = vrcp.f32 %v2217_v36  ;;  %v4703_v36 = vld [vmem:[#allocation37_spill] sm:$0xff] }
 0x6a8   :  { %v3649_v13 = vpop.eup %3648 }
 0x6a9   :  { %v3651_v34 = vpop.eup %3650  ;;  %v2221_v35 = vmul.f32 %v3649_v13, %v3647_v63 }
 0x6aa   :  { %v2220_v37 = vmul.f32 %v3651_v34, %v4527_v28  ;;  %v3653_v40 = vpop.eup %3652  ;;  %v4702_v34 = vld [vmem:[#allocation42_spill] sm:$0xff] }
 0x6ac   :  { %v4569_v61 = vadd.f32 %v2221_v35, %v2220_v37 }
 0x6ae   :  { %3654 = vtanh.f32 %v4569_v61 }
 0x6b8   :  { %v3655_v41 = vpop.eup %3654 }
 0x6b9   :  { %v2224_v42 = vmul.f32 %v3655_v41, %v3653_v40  ;;  %v4704_v41 = vld [vmem:[#allocation43_spill] sm:$0xff] }
 0x6bb   :  { %v2225_v39 = vpack.c.bf16 %v2224_v42, %v2224_v42 }
 0x6bd   :  { %2227 = vst [vmem:[#allocation5 + $0x14] sm:$0xf] %v2225_v39  ;;  %2458 = vmatmul.mubr.bf16.vlgmr.msra.gmra.mrb[36].mxu0 %v2225_v39  ;;  %2499 = vmatmul.mubr.bf16.vlgmr.msra.gmra.mrb[44].mxu1 %v2225_v39  ;;  %v4705_v39 = vld [vmem:[#allocation39_spill] sm:$0xff] }
 0x6be   :  { %2732 = vmatpush1.bf16.msra.mxu0 %v4402_v26  ;;  %2773 = vmatpush1.bf16.msra.mxu1 %v4404_v52  ;;  %v3536_v26 = vld [vmem:[#allocation14 + $0x80] ss:$16 sps:$4 sm:$0xff]   ;;  %v3541_v52 = vld [vmem:[#allocation14 + $0xa4] ss:$16 sps:$4 sm:$0xff]  }
 0x6bf   :  { %2733 = vmatprep.subr.bf16.mxu0 %v4410_v45  ;;  %2774 = vmatprep.subr.bf16.mxu1 %v4412_v47  ;;  %v3539_v45 = vld [vmem:[#allocation14 + $0xa0] ss:$16 sps:$4 sm:$0xff]   ;;  %v3544_v47 = vld [vmem:[#allocation14 + $0xc4] ss:$16 sps:$4 sm:$0xff]  }
 0x6c0   :  { %2763 = vmatprep.mubr.bf16.mxu0 %v4688_v9  ;;  %2804 = vmatprep.mubr.bf16.mxu1 %v4688_v9  ;;  %v3538_v9 = vld [vmem:[#allocation14 + $0x84] ss:$16 sps:$4 sm:$0xff]  }
 0x6c2   :  { %2734 = vmatpush1.bf16.msra.mxu0 %v4414_v53  ;;  %2775 = vmatpush1.bf16.msra.mxu1 %v4416_v56  ;;  %v3542_v53 = vld [vmem:[#allocation14 + $0xc0] ss:$16 sps:$4 sm:$0xff]   ;;  %v3547_v56 = vld [vmem:[#allocation14 + $0xe4] ss:$16 sps:$4 sm:$0xff]  }
 0x6c3   :  { %2735 = vmatprep.subr.bf16.mxu0 %v4422_v2  ;;  %2776 = vmatprep.subr.bf16.mxu1 %v4424_v55  ;;  %v3545_v2 = vld [vmem:[#allocation14 + $0xe0] ss:$16 sps:$4 sm:$0xff]  }
 0x6c4   :  { %v3548_v55 = vld [vmem:[#allocation15] sm:$0xff]  }
 0x6c5   :  { %v3558_v60 = vld [vmem:[#allocation5 + $0x10] sm:$0xff]  }
 0x6c6   :  { %2736 = vmatpush1.bf16.msra.mxu0 %v4426_v1  ;;  %2777 = vmatpush1.bf16.msra.mxu1 %v4428_v58 }
 0x6c7   :  { %2737 = vmatprep.subr.bf16.mxu0 %v4434_v0  ;;  %2778 = vmatprep.subr.bf16.mxu1 %v4436_v54  ;;  %v4699_v54 = vld [vmem:[#allocation34_spill] sm:$0xff] }
 0x6ca   :  { %2738 = vmatpush1.bf16.msra.mxu0 %v4438_v48  ;;  %2779 = vmatpush1.bf16.msra.mxu1 %v4440_v49 }
 0x6cb   :  { %2780 = vmatprep.subr.bf16.mxu1 %v4449_v51  ;;  %2739 = vmatprep.subr.bf16.mxu0 %v3538_v9  ;;  %v4700_v51 = vld [vmem:[#allocation41_spill] sm:$0xff] }
 0x6ce   :  { %2781 = vmatpush1.bf16.msra.mxu1 %v4447_v50  ;;  %2740 = vmatpush1.bf16.msra.mxu0 %v3536_v26 }
 0x6cf   :  { %2782 = vmatprep.subr.bf16.mxu1 %v4451_v43  ;;  %2741 = vmatprep.subr.bf16.mxu0 %v3541_v52 }
 0x6d2   :  { %2783 = vmatpush1.bf16.msra.mxu1 %v4456_v29  ;;  %2742 = vmatpush1.bf16.msra.mxu0 %v3539_v45  ;;  %v4701_v29 = vld [vmem:[#allocation35_spill] sm:$0xff] }
 0x6d3   :  { %2784 = vmatprep.subr.bf16.mxu1 %v4460_v30  ;;  %2743 = vmatprep.subr.bf16.mxu0 %v3544_v47 }
 0x6d6   :  { %2785 = vmatpush1.bf16.msra.mxu1 %v4464_v31  ;;  %2744 = vmatpush1.bf16.msra.mxu0 %v3542_v53 }
 0x6d7   :  { %2786 = vmatprep.subr.bf16.mxu1 %v4468_v32  ;;  %2745 = vmatprep.subr.bf16.mxu0 %v3547_v56 }
 0x6da   :  { %2787 = vmatpush1.bf16.msra.mxu1 %v4472_v33  ;;  %2746 = vmatpush1.bf16.msra.mxu0 %v3545_v2 }
 0x6db   :  { %3390 = vmatprep.subr.bf16.mxu0 %v3548_v55 }
 0x790   :  { %v2459_v1 = vpop.f32.mrb[36].mxu0  ;;  %v2500_v58 = vpop.f32.mrb[44].mxu1 }
 0x791   :  { %v2460_v0 = vadd.f32 %v2459_v1, %v4283_v14  ;;  %v2501_v48 = vadd.f32 %v2500_v58, %v4699_v54  ;;  %v2461_v49 = vpop.f32.mrb[37].mxu0  ;;  %v2502_v50 = vpop.f32.mrb[45].mxu1 }
 0x792   :  { %v2462_v43 = vadd.f32 %v2461_v49, %v4700_v51  ;;  %v2503_v30 = vadd.f32 %v2502_v50, %v4701_v29  ;;  %v2463_v31 = vpop.f32.mrb[38].mxu0  ;;  %v2504_v32 = vpop.f32.mrb[46].mxu1 }
 0x793   :  { %v3327_v33 = vmul.f32 -1.442695, %v2460_v0  ;;  %v2464_v3 = vpop.f32.mrb[39].mxu0  ;;  %v2505_v16 = vpop.f32.mrb[47].mxu1 }
 0x794   :  { %v3328_v28 = vmul.f32 -1.442695, %v2462_v43  ;;  %v3329_v44 = vmul.f32 -1.442695, %v2503_v30  ;;  %v4612_v30 = vld [vmem:[%s4665_s7] ss:$0 sm:$0xff] }
 0x795   :  { %3656 = vpow2.f32 %v3327_v33  ;;  %s3909_s7 = smov [#allocation18]  }
 0x796   :  { %3658 = vpow2.f32 %v3328_v28  ;;  %s3040_s16 = sshll.u32 %s3909_s7, 4  ;;  %s3041_s16 = int_to_ptr.vmem [resolvable:$true] %s3040_s16 }
 0x797   :  { %3660 = vpow2.f32 %v3329_v44  ;;  %s3820_s15 = scalar_lea.vmem %s3041_s16, 128  ;;  %p3825_p7 = scmp.lt.s32.totalorder %s3041_s16, %s3041_s16 }
 0x798   :  { %3662 = vtanh.f32 %v2501_v48  ;;  %p3821_p6 = scmp.ne.s32.totalorder %s3041_s16, %s3820_s15  ;;  %p3826_p8 = scmp.lt.s32.totalorder %s3820_s15, %s3820_s15 }
 0x79a   :  { %p3827_p9 = por %p3826_p8, %p3825_p7 }
 0x79c   :  { %p3828_p10 = pnand %p3827_p9, %p3821_p6 }
 0x79f   :  { %v3657_v15 = vpop.eup %3656 }
 0x7a0   :  { %v3659_v57 = vpop.eup %3658  ;;  %v2510_v14 = vadd.f32 1.0, %v3657_v15 }
 0x7a1   :  { %v2516_v46 = vadd.f32 1.0, %v3659_v57  ;;  %v3661_v4 = vpop.eup %3660 }
 0x7a2   :  { %3664 = vrcp.f32 %v2510_v14  ;;  %v3663_v6 = vpop.eup %3662  ;;  %v2523_v11 = vadd.f32 1.0, %v3661_v4 }
 0x7a3   :  { %3666 = vrcp.f32 %v2516_v46 }
 0x7a4   :  { %3668 = vrcp.f32 %v2523_v11 }
 0x7ac   :  { %v3665_v7 = vpop.eup %3664 }
 0x7ad   :  { %v3667_v8 = vpop.eup %3666  ;;  %v2527_v10 = vmul.f32 %v3665_v7, %v3663_v6 }
 0x7ae   :  { %v2526_v38 = vmul.f32 %v3667_v8, %v4569_v61  ;;  %v3669_v21 = vpop.eup %3668 }
 0x7b0   :  { %v4601_v12 = vadd.f32 %v2527_v10, %v2526_v38 }
 0x7b2   :  { %3670 = vtanh.f32 %v4601_v12 }
 0x7bc   :  { %v3671_v17 = vpop.eup %3670 }
 0x7bd   :  { %v2530_v18 = vmul.f32 %v3671_v17, %v3669_v21 }
 0x7bf   :  { %v2531_v27 = vpack.c.bf16 %v2530_v18, %v2530_v18 }
 0x7c1   :  { %2533 = vst [vmem:[#allocation5 + $0x18] sm:$0xf] %v2531_v27  ;;  %2764 = vmatmul.mubr.bf16.vlgmr.msra.gmra.mrb[40].mxu0 %v2531_v27  ;;  %2805 = vmatmul.mubr.bf16.vlgmr.msra.gmra.mrb[48].mxu1 %v2531_v27 }
 0x7c2   :  { %3391 = vmatpush3.bf16.msra.mxu0 %v3548_v55  ;;  %3406 = vmatprep.mubr.bf16.mxu0 %v3549_v20 }
 0x7c3   :  { %3392 = vmatprep.subr.bf16.mxu0 %v3550_v19 }
 0x7c6   :  { %3393 = vmatpush3.bf16.msra.mxu0 %v3550_v19 }
 0x7c7   :  { %3394 = vmatprep.subr.bf16.mxu0 %v3551_v22 }
 0x7ca   :  { %3395 = vmatpush3.bf16.msra.mxu0 %v3551_v22 }
 0x7cb   :  { %3396 = vmatprep.subr.bf16.mxu0 %v3552_v25 }
 0x7ce   :  { %3397 = vmatpush3.bf16.msra.mxu0 %v3552_v25 }
 0x7cf   :  { %3398 = vmatprep.subr.bf16.mxu0 %v3553_v5 }
 0x7d2   :  { %3399 = vmatpush3.bf16.msra.mxu0 %v3553_v5 }
 0x7d3   :  { %3400 = vmatprep.subr.bf16.mxu0 %v3554_v23 }
 0x7d6   :  { %3401 = vmatpush3.bf16.msra.mxu0 %v3554_v23 }
 0x7d7   :  { %3402 = vmatprep.subr.bf16.mxu0 %v3555_v62 }
 0x7da   :  { %3403 = vmatpush3.bf16.msra.mxu0 %v3555_v62 }
 0x7db   :  { %3404 = vmatprep.subr.bf16.mxu0 %v3556_v59 }
 0x7de   :  { %3405 = vmatpush3.bf16.msra.mxu0 %v3556_v59 }
 0x7e1   :  { %3407 = vmatmul.mubr.bf16.vlgmr.msra.gmra.mrb[44].mxu0 %v3557_v24 }
 0x7e2   :  { %3410 = vmatprep.mubr.bf16.mxu0 %v3558_v60 }
 0x894   :  { %v2765_v63 = vpop.f32.mrb[40].mxu0  ;;  %v2806_v13 = vpop.f32.mrb[48].mxu1 }
 0x895   :  { %v2766_v35 = vadd.f32 %v2765_v63, %v4702_v34  ;;  %v2807_v37 = vadd.f32 %v2806_v13, %v4703_v36  ;;  %v2767_v61 = vpop.f32.mrb[41].mxu0  ;;  %v2808_v40 = vpop.f32.mrb[49].mxu1 }
 0x896   :  { %v2768_v42 = vadd.f32 %v2767_v61, %v4704_v41  ;;  %v2809_v9 = vadd.f32 %v2808_v40, %v4705_v39  ;;  %v2769_v26 = vpop.f32.mrb[42].mxu0  ;;  %v2810_v52 = vpop.f32.mrb[50].mxu1 }
 0x897   :  { %v3362_v45 = vmul.f32 -1.442695, %v2766_v35  ;;  %v2770_v47 = vpop.f32.mrb[43].mxu0  ;;  %v2811_v53 = vpop.f32.mrb[51].mxu1 }
 0x898   :  { %v3363_v56 = vmul.f32 -1.442695, %v2768_v42  ;;  %v3364_v2 = vmul.f32 -1.442695, %v2809_v9 }
 0x899   :  { %3672 = vpow2.f32 %v3362_v45 }
 0x89a   :  { %3674 = vpow2.f32 %v3363_v56 }
 0x89b   :  { %3676 = vpow2.f32 %v3364_v2 }
 0x89c   :  { %3678 = vtanh.f32 %v2807_v37 }
 0x8a3   :  { %v3673_v55 = vpop.eup %3672 }
 0x8a4   :  { %v3675_v1 = vpop.eup %3674  ;;  %v2816_v58 = vadd.f32 1.0, %v3673_v55 }
 0x8a5   :  { %v2822_v0 = vadd.f32 1.0, %v3675_v1  ;;  %v3677_v54 = vpop.eup %3676 }
 0x8a6   :  { %3680 = vrcp.f32 %v2816_v58  ;;  %v3679_v48 = vpop.eup %3678  ;;  %v2829_v43 = vadd.f32 1.0, %v3677_v54 }
 0x8a7   :  { %3682 = vrcp.f32 %v2822_v0 }
 0x8a8   :  { %3684 = vrcp.f32 %v2829_v43 }
 0x8b0   :  { %v3681_v49 = vpop.eup %3680 }
 0x8b1   :  { %v3683_v50 = vpop.eup %3682  ;;  %v2833_v51 = vmul.f32 %v3681_v49, %v3679_v48 }
 0x8b2   :  { %v2832_v29 = vmul.f32 %v3683_v50, %v4601_v12  ;;  %v3685_v14 = vpop.eup %3684 }
 0x8b4   :  { %v2834_v31 = vadd.f32 %v2833_v51, %v2832_v29  ;;  %v3408_v32 = vpop.f32.mrb[44].mxu0 }
 0x8b5   :  { %v2988_v33 = vadd.f32 %v3408_v32, %v4612_v30  ;;  %v2979_v3 = vpop.f32.mrb[45].mxu0 }
 0x8b6   :  { %3686 = vtanh.f32 %v2834_v31  ;;  %3021 = vst [vmem:[#allocation20] sm:$0xff] %v2834_v31  ;;  %v2980_v16 = vadd.f32 %v4612_v30, %v2979_v3  ;;  %v3409_v28 = vpop.f32.mrb[46].mxu0 }
 0x8b7   :  { %3012 = vst [vmem:[#allocation17 + $0x10] sm:$0xff] %v2988_v33  ;;  %v2991_v44 = vadd.f32 %v3409_v28, %v4612_v30  ;;  %v2982_v15 = vpop.f32.mrb[47].mxu0 }
 0x8b8   :  { %3010 = vst [vmem:[#allocation17] sm:$0xff] %v2980_v16  ;;  %v2983_v57 = vadd.f32 %v4612_v30, %v2982_v15 }
 0x8b9   :  { %3013 = vst [vmem:[#allocation17 + $0x18] sm:$0xff] %v2991_v44 }
 0x8ba   :  { %3011 = vst [vmem:[#allocation17 + $0x8] sm:$0xff] %v2983_v57 }
 0x8c0   :  { %v3687_v46 = vpop.eup %3686 }
 0x8c1   :  { %v2836_v4 = vmul.f32 %v3687_v46, %v3685_v14 }
 0x8c3   :  { %v2837_v6 = vpack.c.bf16 %v2836_v4, %v2836_v4  ;;  %3019 = vst [vmem:[#allocation18] sm:$0xff] %v2836_v4 }
 0x8c5   :  { %2839 = vst [vmem:[#allocation5 + $0x1c] sm:$0xf] %v2837_v6 }
 0x8cc   :  { %v3559_v7 = vld [vmem:[#allocation5 + $0x18] sm:$0xff]  }
 0x8cd   :  { %3411 = vmatmul.mubr.bf16.gmra.mrb[48].mxu0 %v3559_v7 }
 0x8ce   :  { %3831 = shalt.err (!%p3828_p10)
}
 0x8cf   :  { %s3832_s29 = scalar_lea.hbm %s4667_s9, 128 }
 0x8d0   :  { %p3833_p11 = scmp.ne.s32.totalorder %s4667_s9, %s3832_s29  ;;  %p3836_p12 = scmp.lt.u32.totalorder %s3832_s29, %s4667_s9 }
 0x8d2   :  { %p3838_p13 = pnand %p3836_p12, %p3833_p11 }
 0x8d4   :  { %3841 = shalt.err (!%p3838_p13)
}
 0x8d5   :  { %3043 = dma.vmem_to_hbm [thread:$0]  %s3041_s16, 128, %s4667_s9, [#allocation19]  }
 0x8d6   :  { %s3910_s18 = smov [#allocation20]  }
 0x8d7   :  { %s3050_s19 = sshll.u32 %s3910_s18, 4  ;;  %s3051_s19 = int_to_ptr.vmem [resolvable:$true] %s3050_s19 }
 0x8d8   :  { %s3842_s21 = scalar_lea.vmem %s3051_s19, 128  ;;  %p3847_p1 = scmp.lt.s32.totalorder %s3051_s19, %s3051_s19 }
 0x8d9   :  { %p3843_p0 = scmp.ne.s32.totalorder %s3051_s19, %s3842_s21  ;;  %p3848_p2 = scmp.lt.s32.totalorder %s3842_s21, %s3842_s21 }
 0x8db   :  { %p3849_p3 = por %p3848_p2, %p3847_p1 }
 0x8dd   :  { %p3850_p4 = pnand %p3849_p3, %p3843_p0 }
 0x8df   :  { %3853 = shalt.err (!%p3850_p4)
}
 0x8e0   :  { %s3854_s24 = scalar_lea.hbm %s4668_s10, 128 }
 0x8e1   :  { %p3855_p5 = scmp.ne.s32.totalorder %s4668_s10, %s3854_s24  ;;  %p3858_p6 = scmp.lt.u32.totalorder %s3854_s24, %s4668_s10 }
 0x8e3   :  { %p3860_p7 = pnand %p3858_p6, %p3855_p5 }
 0x8e5   :  { %3863 = shalt.err (!%p3860_p7)
}
 0x8e6   :  { %3053 = dma.vmem_to_hbm [thread:$0]  %s3051_s19, 128, %s4668_s10, [#allocation19]  }
 0x8e7   :  { %s3911_s1 = smov [#allocation17]  }
 0x8e8   :  { %s3027_s6 = sshll.u32 %s3911_s1, 4  ;;  %s3028_s6 = int_to_ptr.vmem [resolvable:$true] %s3027_s6 }
 0x8e9   :  { %s3864_s10 = scalar_lea.vmem %s3028_s6, 1024  ;;  %p3869_p9 = scmp.lt.s32.totalorder %s3028_s6, %s3028_s6 }
 0x8ea   :  { %p3865_p8 = scmp.ne.s32.totalorder %s3028_s6, %s3864_s10  ;;  %p3870_p10 = scmp.lt.s32.totalorder %s3864_s10, %s3864_s10 }
 0x8ec   :  { %p3871_p11 = por %p3870_p10, %p3869_p9 }
 0x8ee   :  { %p3872_p12 = pnand %p3871_p11, %p3865_p8 }
 0x9a0   :  { %v3412_v8 = vpop.f32.mrb[48].mxu0 }
 0x9a1   :  { %v3004_v10 = vadd.f32 %v3412_v8, %v4612_v30  ;;  %v2995_v11 = vpop.f32.mrb[49].mxu0 }
 0x9a2   :  { %v2996_v38 = vadd.f32 %v4612_v30, %v2995_v11  ;;  %v3413_v12 = vpop.f32.mrb[50].mxu0 }
 0x9a3   :  { %3016 = vst [vmem:[#allocation17 + $0x30] sm:$0xff] %v3004_v10  ;;  %v3007_v21 = vadd.f32 %v3413_v12, %v4612_v30  ;;  %v2998_v17 = vpop.f32.mrb[51].mxu0 }
 0x9a4   :  { %3014 = vst [vmem:[#allocation17 + $0x20] sm:$0xff] %v2996_v38  ;;  %v2999_v18 = vadd.f32 %v4612_v30, %v2998_v17 }
 0x9a5   :  { %3017 = vst [vmem:[#allocation17 + $0x38] sm:$0xff] %v3007_v21 }
 0x9a6   :  { %3015 = vst [vmem:[#allocation17 + $0x28] sm:$0xff] %v2999_v18 }
 0x9a7   :  { %3875 = shalt.err (!%p3872_p12)
}
 0x9a8   :  { %s3876_s3 = scalar_lea.hbm %s4666_s8, 1024 }
 0x9a9   :  { %p3877_p13 = scmp.ne.s32.totalorder %s4666_s8, %s3876_s3  ;;  %p3880_p0 = scmp.lt.u32.totalorder %s3876_s3, %s4666_s8 }
 0x9ab   :  { %p3882_p1 = pnand %p3880_p0, %p3877_p13 }
 0x9ad   :  { %3885 = shalt.err (!%p3882_p1)
}
 0x9ae   :  { %s3912_s28 = smov 128   ;;  %s3913_s29 = smov 8  }
 0x9af   :  { %3033 = dma.vmem_to_hbm [thread:$0]  %s3028_s6, 1024, %s4666_s8, [#allocation8], %s3912_s28, %s3912_s28, %s3913_s29  }
 0x9b0   :  { %3894 = dma.done.wait [#allocation8], 1024  }
 0x9b1   :  { %3895 = vsyncadd [#allocation8], 4294966272 }
 0x9b2   :  { %3896 = dma.done.wait [#allocation19], 256  }
 0x9b3   :  { %3897 = vsyncadd [#allocation19], 4294967040 }
 0x9b4   :  { %3063 = vsyncpa [#allocation7], 1 }
 0x9b5   :  { %3064 = vsyncpa [#allocation10], 1 }
 0x9b6   :  { %3065 = vsyncpa [#allocation13], 1 }
 0x9b7   :  { %3066 = vsyncpa [#allocation16], 1 }
 0x9b8   :  { %3067 = vsyncpa [#allocation8], 1 }
 0x9b9   :  { %3068 = vsyncpa [#allocation19], 1 }

</bundles_post_ra>
